<compile_context>
chip_gen: v5e
topology: v5e:2x2
jax: 0.10.0
libtpu: 0.0.40
codegen_flags: <defaults>
</compile_context>

<pallas_src>
import math

import jax
import jax.numpy as jnp
from jax.experimental import pallas as pl
from jax.experimental.pallas import tpu as pltpu

BN_EPS = 1e-5
OUT_FEATURES = 6
OUT_PAD = 128  # lane-dense padded output width per head


def _s2s2_fused_kernel(x_ref, w1_ref, aux1_ref, w2_ref, aux2_ref, w3_ref, b3_ref, out_ref):
    """Single grid step, all heads. aux rows: 0 = BN gamma, 1 = BN beta."""
    H, F1, F2 = w2_ref.shape
    OUTP = w3_ref.shape[2]

    def bn_relu(h, gamma, beta):
        # Training-mode BatchNorm1d (batch stats, biased variance), folded into one
        # scale/shift and fused with the ReLU.  rsqrt goes to the EUP slot.
        # The preceding Linear bias cancels exactly under batch-mean subtraction and is
        # therefore not applied here at all.
        mean = jnp.mean(h, axis=0, keepdims=True)
        var = jnp.mean(jnp.square(h - mean), axis=0, keepdims=True)
        scale = gamma * jax.lax.rsqrt(var + BN_EPS)
        shift = beta - mean * scale
        return jnp.maximum(h * scale + shift, 0.0)

    x = x_ref[...]  # (B, D)

    # ---- Layer 1, fused across all heads: one (B, D) @ (D, H*F1) MXU matmul ----
    aux1 = aux1_ref[...]                                        # (8, H*F1)
    h1 = jnp.dot(x, w1_ref[...], preferred_element_type=jnp.float32)
    h1 = bn_relu(h1, aux1[0:1, :], aux1[1:2, :])                # (B, H*F1)

    # ---- Layers 2-3 per head (H is small & static -> unrolled Python loop) ----
    for h in range(H):
        h1_h = h1[:, h * F1:(h + 1) * F1]                       # (B, F1), lane-aligned slice
        a2 = aux2_ref[h]                                        # (8, F2)
        h2 = jnp.dot(h1_h, w2_ref[h], preferred_element_type=jnp.float32)
        h2 = bn_relu(h2, a2[0:1, :], a2[1:2, :])                # (B, F2)
        # Final matmul is padded to OUTP=128 lanes -> full-lane unmasked store.
        out_ref[:, h * OUTP:(h + 1) * OUTP] = (
            jnp.dot(h2, w3_ref[h], preferred_element_type=jnp.float32)
            + b3_ref[0:1, h * OUTP:(h + 1) * OUTP]
        )


def s2s2_regressor_forward(latent, params):
    """latent: (B, D) float32. Returns (B, H, 6), matching torch.stack(outputs, dim=1)."""
    B, D = latent.shape
    H, F1, F2 = params["w2"].shape
    OUTP = params["w3p"].shape[2]
    OUT = params["out_features"]

    flops = 2 * B * (D * H * F1 + H * F1 * F2 + H * F2 * OUTP)
    bytes_accessed = 4 * (
        latent.size + params["w1_all"].size + params["aux1"].size + params["w2"].size
        + params["aux2"].size + params["w3p"].size + params["b3p"].size + B * H * OUTP
    )

    out = pl.pallas_call(
        _s2s2_fused_kernel,
        out_shape=jax.ShapeDtypeStruct((B, H * OUTP), jnp.float32),
        grid_spec=pltpu.PrefetchScalarGridSpec(
            num_scalar_prefetch=0,
            grid=(1,),
            in_specs=[
                pl.BlockSpec((B, D), lambda i: (0, 0)),            # latent
                pl.BlockSpec((D, H * F1), lambda i: (0, 0)),       # w1 (all heads, lane-concat)
                pl.BlockSpec((8, H * F1), lambda i: (0, 0)),       # aux1: gamma1/beta1
                pl.BlockSpec((H, F1, F2), lambda i: (0, 0, 0)),    # w2 per head
                pl.BlockSpec((H, 8, F2), lambda i: (0, 0, 0)),     # aux2: gamma2/beta2
                pl.BlockSpec((H, F2, OUTP), lambda i: (0, 0, 0)),  # w3 padded to 128 lanes
                pl.BlockSpec((8, H * OUTP), lambda i: (0, 0)),     # b3 padded
            ],
            out_specs=pl.BlockSpec((B, H * OUTP), lambda i: (0, 0)),
        ),
        compiler_params=pltpu.CompilerParams(dimension_semantics=("arbitrary",)),
        cost_estimate=pl.CostEstimate(
            flops=flops,
            transcendentals=H * (F1 + F2),
            bytes_accessed=bytes_accessed,
        ),
    )(
        latent,
        params["w1_all"], params["aux1"],
        params["w2"], params["aux2"],
        params["w3p"], params["b3p"],
    )

    # lane-dense (B, H*128) slab -> (B, H, 6) (pure reshape + slice, no transpose)
    return out.reshape(B, H, OUTP)[:, :, :OUT]


def init_params(key, latent_code_size, heads=1, features=(512, 256), out_features=OUT_FEATURES):
    """Deterministic init mirroring the PyTorch module:
       - Linear weights: kaiming_normal_(fan_in, relu) -> N(0, sqrt(2/fan_in))
       - Linear biases : PyTorch default U(-1/sqrt(fan_in), 1/sqrt(fan_in))
       - BatchNorm1d   : gamma=1, beta=0
       Per-head weights stored as (in, out) (transpose of PyTorch's (out, in)), then packed
       into the fused / lane-dense kernel layout."""
    D = latent_code_size
    F1, F2 = features
    dims = [D, F1, F2, out_features]

    raw = {}
    for li in range(3):
        fan_in, fan_out = dims[li], dims[li + 1]
        key, kw, kb = jax.random.split(key, 3)
        std = math.sqrt(2.0 / fan_in)
        bound = 1.0 / math.sqrt(fan_in)
        raw[f"w{li + 1}"] = std * jax.random.normal(kw, (heads, fan_in, fan_out), jnp.float32)
        raw[f"b{li + 1}"] = jax.random.uniform(kb, (heads, fan_out), jnp.float32,
                                               minval=-bound, maxval=bound)

    params = {"out_features": out_features, "raw": raw}

    # --- fused / lane-dense kernel layout ---
    # Layer 1: concatenate heads along the output (lane) axis -> (D, H*F1)
    params["w1_all"] = jnp.transpose(raw["w1"], (1, 0, 2)).reshape(D, heads * F1)
    aux1 = jnp.zeros((8, heads * F1), jnp.float32)
    aux1 = aux1.at[0].set(1.0)                     # BN gamma (row 1 = beta stays 0)
    params["aux1"] = aux1                          # Linear bias cancels under training-mode BN

    # Layer 2: per-head weights + packed aux
    params["w2"] = raw["w2"]                       # (H, F1, F2)
    aux2 = jnp.zeros((heads, 8, F2), jnp.float32)
    aux2 = aux2.at[:, 0, :].set(1.0)               # BN gamma (row 1 = beta stays 0)
    params["aux2"] = aux2

    # Layer 3: zero-pad to 128 output lanes per head
    w3p = jnp.zeros((heads, F2, OUT_PAD), jnp.float32)
    w3p = w3p.at[:, :, :out_features].set(raw["w3"])
    params["w3p"] = w3p
    b3p_rows = jnp.zeros((heads, OUT_PAD), jnp.float32)
    b3p_rows = b3p_rows.at[:, :out_features].set(raw["b3"])
    params["b3p"] = jnp.concatenate(
        [b3p_rows.reshape(1, heads * OUT_PAD),
         jnp.zeros((7, heads * OUT_PAD), jnp.float32)], axis=0)
    return params


def _reference_forward(latent, params):
    """Pure-JAX reference of the same math (per-head, un-fused, WITH the Linear bias),
       used to verify the kernel (and the bias-cancellation fold) numerically."""
    raw = params["raw"]
    H = raw["w1"].shape[0]
    outs = []
    for h in range(H):
        x = latent
        for li in (1, 2):
            x = x @ raw[f"w{li}"][h] + raw[f"b{li}"][h]
            m = jnp.mean(x, axis=0, keepdims=True)
            v = jnp.mean((x - m) ** 2, axis=0, keepdims=True)
            x = (x - m) * jax.lax.rsqrt(v + BN_EPS)   # gamma=1, beta=0
            x = jnp.maximum(x, 0.0)
        outs.append(x @ raw["w3"][h] + raw["b3"][h])
    return jnp.stack(outs, axis=1)


if __name__ == "__main__":
    LATENT = 32   # latent_code_size
    HEADS = 2
    BATCH = 8

    key = jax.random.PRNGKey(0)
    key, kx = jax.random.split(key)
    latent = jax.random.normal(kx, (BATCH, LATENT), jnp.float32)

    params = init_params(key, LATENT, heads=HEADS)

    out = jax.block_until_ready(s2s2_regressor_forward(latent, params))
    assert out.shape == (BATCH, HEADS, OUT_FEATURES), out.shape

    ref = _reference_forward(latent, params)
    assert jnp.max(jnp.abs(out - ref)) < 1e-4, float(jnp.max(jnp.abs(out - ref)))

    print("KERNEL_OK")
</pallas_src>

<mosaic_0001>
module attributes {stable_mosaic.version = 11 : i64} {
  func.func @_s2s2_fused_kernel(%arg0: i32, %arg1: memref<8x32xf32, #tpu.memory_space<vmem>>, %arg2: memref<32x1024xf32, #tpu.memory_space<vmem>>, %arg3: memref<8x1024xf32, #tpu.memory_space<vmem>>, %arg4: memref<2x512x256xf32, #tpu.memory_space<vmem>>, %arg5: memref<2x8x256xf32, #tpu.memory_space<vmem>>, %arg6: memref<2x256x128xf32, #tpu.memory_space<vmem>>, %arg7: memref<8x256xf32, #tpu.memory_space<vmem>>, %arg8: memref<8x256xf32, #tpu.memory_space<vmem>>) attributes {dimension_semantics = [#tpu.dimension_semantics<arbitrary>], iteration_bounds = array<i64: 1>, scalar_prefetch = 0 : i64, scratch_operands = 0 : i64, tpu.core_type = #tpu.core_type<tc>, window_params = [{pipeline_mode = #tpu.pipeline_mode<synchronous>, transform_indices = @transform_0, window_bounds = array<i64: 8, 32>}, {pipeline_mode = #tpu.pipeline_mode<synchronous>, transform_indices = @transform_1, window_bounds = array<i64: 32, 1024>}, {pipeline_mode = #tpu.pipeline_mode<synchronous>, transform_indices = @transform_2, window_bounds = array<i64: 8, 1024>}, {pipeline_mode = #tpu.pipeline_mode<synchronous>, transform_indices = @transform_3, window_bounds = array<i64: 2, 512, 256>}, {pipeline_mode = #tpu.pipeline_mode<synchronous>, transform_indices = @transform_4, window_bounds = array<i64: 2, 8, 256>}, {pipeline_mode = #tpu.pipeline_mode<synchronous>, transform_indices = @transform_5, window_bounds = array<i64: 2, 256, 128>}, {pipeline_mode = #tpu.pipeline_mode<synchronous>, transform_indices = @transform_6, window_bounds = array<i64: 8, 256>}, {pipeline_mode = #tpu.pipeline_mode<synchronous>, transform_indices = @transform_7, window_bounds = array<i64: 8, 256>}]} {
    %c0 = arith.constant 0 : index
    %c0_0 = arith.constant 0 : index
    %0 = vector.load %arg1[%c0, %c0_0] : memref<8x32xf32, #tpu.memory_space<vmem>>, vector<8x32xf32>
    %c0_1 = arith.constant 0 : index
    %c0_2 = arith.constant 0 : index
    %1 = vector.load %arg3[%c0_1, %c0_2] : memref<8x1024xf32, #tpu.memory_space<vmem>>, vector<8x1024xf32>
    %c0_3 = arith.constant 0 : index
    %c0_4 = arith.constant 0 : index
    %2 = vector.load %arg2[%c0_3, %c0_4] : memref<32x1024xf32, #tpu.memory_space<vmem>>, vector<32x1024xf32>
    %cst = arith.constant dense<0.000000e+00> : vector<8x1024xf32>
    %3 = tpu.matmul %0, %2, %cst {dimension_numbers = #tpu.dot_dimension_numbers<[1], [0], [0], [1], [0, 0, 1, 1], [], []>} : vector<8x32xf32>, vector<32x1024xf32>, vector<8x1024xf32> -> vector<8x1024xf32>
    %4 = vector.extract_strided_slice %1 {offsets = [0, 0], sizes = [1, 1024], strides = [1, 1]} : vector<8x1024xf32> to vector<1x1024xf32>
    %5 = vector.extract_strided_slice %1 {offsets = [1, 0], sizes = [1, 1024], strides = [1, 1]} : vector<8x1024xf32> to vector<1x1024xf32>
    %cst_5 = arith.constant dense<0.000000e+00> : vector<1024xf32>
    %6 = vector.multi_reduction <add>, %3, %cst_5 [0] : vector<8x1024xf32> to vector<1024xf32>
    %7 = vector.shape_cast %6 : vector<1024xf32> to vector<1x1024xf32>
    %cst_6 = arith.constant 8.000000e+00 : f32
    %8 = vector.broadcast %cst_6 : f32 to vector<1x1024xf32>
    %9 = arith.divf %7, %8 : vector<1x1024xf32>
    %10 = vector.broadcast %9 : vector<1x1024xf32> to vector<8x1024xf32>
    %11 = arith.subf %3, %10 : vector<8x1024xf32>
    %12 = arith.mulf %11, %11 : vector<8x1024xf32>
    %cst_7 = arith.constant dense<0.000000e+00> : vector<1024xf32>
    %13 = vector.multi_reduction <add>, %12, %cst_7 [0] : vector<8x1024xf32> to vector<1024xf32>
    %14 = vector.shape_cast %13 : vector<1024xf32> to vector<1x1024xf32>
    %cst_8 = arith.constant 8.000000e+00 : f32
    %15 = vector.broadcast %cst_8 : f32 to vector<1x1024xf32>
    %16 = arith.divf %14, %15 : vector<1x1024xf32>
    %cst_9 = arith.constant 9.99999974E-6 : f32
    %17 = vector.broadcast %cst_9 : f32 to vector<1x1024xf32>
    %18 = arith.addf %16, %17 : vector<1x1024xf32>
    %19 = math.rsqrt %18 : vector<1x1024xf32>
    %20 = arith.mulf %4, %19 : vector<1x1024xf32>
    %21 = arith.mulf %9, %20 : vector<1x1024xf32>
    %22 = arith.subf %5, %21 : vector<1x1024xf32>
    %23 = vector.broadcast %20 : vector<1x1024xf32> to vector<8x1024xf32>
    %24 = arith.mulf %3, %23 : vector<8x1024xf32>
    %25 = vector.broadcast %22 : vector<1x1024xf32> to vector<8x1024xf32>
    %26 = arith.addf %24, %25 : vector<8x1024xf32>
    %cst_10 = arith.constant 0.000000e+00 : f32
    %27 = vector.broadcast %cst_10 : f32 to vector<8x1024xf32>
    %28 = arith.maximumf %26, %27 : vector<8x1024xf32>
    %29 = vector.extract_strided_slice %28 {offsets = [0, 0], sizes = [8, 512], strides = [1, 1]} : vector<8x1024xf32> to vector<8x512xf32>
    %c0_11 = arith.constant 0 : index
    %c0_12 = arith.constant 0 : index
    %c0_13 = arith.constant 0 : index
    %30 = vector.load %arg5[%c0_11, %c0_12, %c0_13] : memref<2x8x256xf32, #tpu.memory_space<vmem>>, vector<1x8x256xf32>
    %31 = vector.shape_cast %30 : vector<1x8x256xf32> to vector<8x256xf32>
    %c0_14 = arith.constant 0 : index
    %c0_15 = arith.constant 0 : index
    %c0_16 = arith.constant 0 : index
    %32 = vector.load %arg4[%c0_14, %c0_15, %c0_16] : memref<2x512x256xf32, #tpu.memory_space<vmem>>, vector<1x512x256xf32>
    %33 = vector.shape_cast %32 : vector<1x512x256xf32> to vector<512x256xf32>
    %cst_17 = arith.constant dense<0.000000e+00> : vector<8x256xf32>
    %34 = tpu.matmul %29, %33, %cst_17 {dimension_numbers = #tpu.dot_dimension_numbers<[1], [0], [0], [1], [0, 0, 1, 1], [], []>} : vector<8x512xf32>, vector<512x256xf32>, vector<8x256xf32> -> vector<8x256xf32>
    %35 = vector.extract_strided_slice %31 {offsets = [0, 0], sizes = [1, 256], strides = [1, 1]} : vector<8x256xf32> to vector<1x256xf32>
    %36 = vector.extract_strided_slice %31 {offsets = [1, 0], sizes = [1, 256], strides = [1, 1]} : vector<8x256xf32> to vector<1x256xf32>
    %cst_18 = arith.constant dense<0.000000e+00> : vector<256xf32>
    %37 = vector.multi_reduction <add>, %34, %cst_18 [0] : vector<8x256xf32> to vector<256xf32>
    %38 = vector.shape_cast %37 : vector<256xf32> to vector<1x256xf32>
    %cst_19 = arith.constant 8.000000e+00 : f32
    %39 = vector.broadcast %cst_19 : f32 to vector<1x256xf32>
    %40 = arith.divf %38, %39 : vector<1x256xf32>
    %41 = vector.broadcast %40 : vector<1x256xf32> to vector<8x256xf32>
    %42 = arith.subf %34, %41 : vector<8x256xf32>
    %43 = arith.mulf %42, %42 : vector<8x256xf32>
    %cst_20 = arith.constant dense<0.000000e+00> : vector<256xf32>
    %44 = vector.multi_reduction <add>, %43, %cst_20 [0] : vector<8x256xf32> to vector<256xf32>
    %45 = vector.shape_cast %44 : vector<256xf32> to vector<1x256xf32>
    %cst_21 = arith.constant 8.000000e+00 : f32
    %46 = vector.broadcast %cst_21 : f32 to vector<1x256xf32>
    %47 = arith.divf %45, %46 : vector<1x256xf32>
    %cst_22 = arith.constant 9.99999974E-6 : f32
    %48 = vector.broadcast %cst_22 : f32 to vector<1x256xf32>
    %49 = arith.addf %47, %48 : vector<1x256xf32>
    %50 = math.rsqrt %49 : vector<1x256xf32>
    %51 = arith.mulf %35, %50 : vector<1x256xf32>
    %52 = arith.mulf %40, %51 : vector<1x256xf32>
    %53 = arith.subf %36, %52 : vector<1x256xf32>
    %54 = vector.broadcast %51 : vector<1x256xf32> to vector<8x256xf32>
    %55 = arith.mulf %34, %54 : vector<8x256xf32>
    %56 = vector.broadcast %53 : vector<1x256xf32> to vector<8x256xf32>
    %57 = arith.addf %55, %56 : vector<8x256xf32>
    %cst_23 = arith.constant 0.000000e+00 : f32
    %58 = vector.broadcast %cst_23 : f32 to vector<8x256xf32>
    %59 = arith.maximumf %57, %58 : vector<8x256xf32>
    %c0_24 = arith.constant 0 : index
    %c0_25 = arith.constant 0 : index
    %c0_26 = arith.constant 0 : index
    %60 = vector.load %arg6[%c0_24, %c0_25, %c0_26] : memref<2x256x128xf32, #tpu.memory_space<vmem>>, vector<1x256x128xf32>
    %61 = vector.shape_cast %60 : vector<1x256x128xf32> to vector<256x128xf32>
    %cst_27 = arith.constant dense<0.000000e+00> : vector<8x128xf32>
    %62 = tpu.matmul %59, %61, %cst_27 {dimension_numbers = #tpu.dot_dimension_numbers<[1], [0], [0], [1], [0, 0, 1, 1], [], []>} : vector<8x256xf32>, vector<256x128xf32>, vector<8x128xf32> -> vector<8x128xf32>
    %c0_28 = arith.constant 0 : index
    %c0_29 = arith.constant 0 : index
    %63 = vector.load %arg7[%c0_28, %c0_29] : memref<8x256xf32, #tpu.memory_space<vmem>>, vector<1x128xf32>
    %64 = vector.broadcast %63 : vector<1x128xf32> to vector<8x128xf32>
    %65 = arith.addf %62, %64 : vector<8x128xf32>
    %c0_30 = arith.constant 0 : index
    %c0_31 = arith.constant 0 : index
    %66 = vector.load %arg8[%c0_30, %c0_31] : memref<8x256xf32, #tpu.memory_space<vmem>>, vector<8x128xf32>
    tpu.vector_store %arg8[%c0_30, %c0_31], %65 {strides = array<i32>} : memref<8x256xf32, #tpu.memory_space<vmem>>, vector<8x128xf32>,
    %67 = vector.extract_strided_slice %28 {offsets = [0, 512], sizes = [8, 512], strides = [1, 1]} : vector<8x1024xf32> to vector<8x512xf32>
    %c1 = arith.constant 1 : index
    %c0_32 = arith.constant 0 : index
    %c0_33 = arith.constant 0 : index
    %68 = vector.load %arg5[%c1, %c0_32, %c0_33] : memref<2x8x256xf32, #tpu.memory_space<vmem>>, vector<1x8x256xf32>
    %69 = vector.shape_cast %68 : vector<1x8x256xf32> to vector<8x256xf32>
    %c1_34 = arith.constant 1 : index
    %c0_35 = arith.constant 0 : index
    %c0_36 = arith.constant 0 : index
    %70 = vector.load %arg4[%c1_34, %c0_35, %c0_36] : memref<2x512x256xf32, #tpu.memory_space<vmem>>, vector<1x512x256xf32>
    %71 = vector.shape_cast %70 : vector<1x512x256xf32> to vector<512x256xf32>
    %cst_37 = arith.constant dense<0.000000e+00> : vector<8x256xf32>
    %72 = tpu.matmul %67, %71, %cst_37 {dimension_numbers = #tpu.dot_dimension_numbers<[1], [0], [0], [1], [0, 0, 1, 1], [], []>} : vector<8x512xf32>, vector<512x256xf32>, vector<8x256xf32> -> vector<8x256xf32>
    %73 = vector.extract_strided_slice %69 {offsets = [0, 0], sizes = [1, 256], strides = [1, 1]} : vector<8x256xf32> to vector<1x256xf32>
    %74 = vector.extract_strided_slice %69 {offsets = [1, 0], sizes = [1, 256], strides = [1, 1]} : vector<8x256xf32> to vector<1x256xf32>
    %cst_38 = arith.constant dense<0.000000e+00> : vector<256xf32>
    %75 = vector.multi_reduction <add>, %72, %cst_38 [0] : vector<8x256xf32> to vector<256xf32>
    %76 = vector.shape_cast %75 : vector<256xf32> to vector<1x256xf32>
    %cst_39 = arith.constant 8.000000e+00 : f32
    %77 = vector.broadcast %cst_39 : f32 to vector<1x256xf32>
    %78 = arith.divf %76, %77 : vector<1x256xf32>
    %79 = vector.broadcast %78 : vector<1x256xf32> to vector<8x256xf32>
    %80 = arith.subf %72, %79 : vector<8x256xf32>
    %81 = arith.mulf %80, %80 : vector<8x256xf32>
    %cst_40 = arith.constant dense<0.000000e+00> : vector<256xf32>
    %82 = vector.multi_reduction <add>, %81, %cst_40 [0] : vector<8x256xf32> to vector<256xf32>
    %83 = vector.shape_cast %82 : vector<256xf32> to vector<1x256xf32>
    %cst_41 = arith.constant 8.000000e+00 : f32
    %84 = vector.broadcast %cst_41 : f32 to vector<1x256xf32>
    %85 = arith.divf %83, %84 : vector<1x256xf32>
    %cst_42 = arith.constant 9.99999974E-6 : f32
    %86 = vector.broadcast %cst_42 : f32 to vector<1x256xf32>
    %87 = arith.addf %85, %86 : vector<1x256xf32>
    %88 = math.rsqrt %87 : vector<1x256xf32>
    %89 = arith.mulf %73, %88 : vector<1x256xf32>
    %90 = arith.mulf %78, %89 : vector<1x256xf32>
    %91 = arith.subf %74, %90 : vector<1x256xf32>
    %92 = vector.broadcast %89 : vector<1x256xf32> to vector<8x256xf32>
    %93 = arith.mulf %72, %92 : vector<8x256xf32>
    %94 = vector.broadcast %91 : vector<1x256xf32> to vector<8x256xf32>
    %95 = arith.addf %93, %94 : vector<8x256xf32>
    %cst_43 = arith.constant 0.000000e+00 : f32
    %96 = vector.broadcast %cst_43 : f32 to vector<8x256xf32>
    %97 = arith.maximumf %95, %96 : vector<8x256xf32>
    %c1_44 = arith.constant 1 : index
    %c0_45 = arith.constant 0 : index
    %c0_46 = arith.constant 0 : index
    %98 = vector.load %arg6[%c1_44, %c0_45, %c0_46] : memref<2x256x128xf32, #tpu.memory_space<vmem>>, vector<1x256x128xf32>
    %99 = vector.shape_cast %98 : vector<1x256x128xf32> to vector<256x128xf32>
    %cst_47 = arith.constant dense<0.000000e+00> : vector<8x128xf32>
    %100 = tpu.matmul %97, %99, %cst_47 {dimension_numbers = #tpu.dot_dimension_numbers<[1], [0], [0], [1], [0, 0, 1, 1], [], []>} : vector<8x256xf32>, vector<256x128xf32>, vector<8x128xf32> -> vector<8x128xf32>
    %c0_48 = arith.constant 0 : index
    %c128 = arith.constant 128 : index
    %101 = vector.load %arg7[%c0_48, %c128] : memref<8x256xf32, #tpu.memory_space<vmem>>, vector<1x128xf32>
    %102 = vector.broadcast %101 : vector<1x128xf32> to vector<8x128xf32>
    %103 = arith.addf %100, %102 : vector<8x128xf32>
    %c0_49 = arith.constant 0 : index
    %c128_50 = arith.constant 128 : index
    %104 = vector.load %arg8[%c0_49, %c128_50] : memref<8x256xf32, #tpu.memory_space<vmem>>, vector<8x128xf32>
    tpu.vector_store %arg8[%c0_49, %c128_50], %103 {strides = array<i32>} : memref<8x256xf32, #tpu.memory_space<vmem>>, vector<8x128xf32>,
    return
  }
  func.func @transform_0(%arg0: i32) -> (i32, i32) {
    %c0_i32 = arith.constant 0 : i32
    %c0_i32_0 = arith.constant 0 : i32
    %c0_i32_1 = arith.constant 0 : i32
    return %c0_i32, %c0_i32_0 : i32, i32
  }
  func.func @transform_1(%arg0: i32) -> (i32, i32) {
    %c0_i32 = arith.constant 0 : i32
    %c0_i32_0 = arith.constant 0 : i32
    %c0_i32_1 = arith.constant 0 : i32
    return %c0_i32, %c0_i32_0 : i32, i32
  }
  func.func @transform_2(%arg0: i32) -> (i32, i32) {
    %c0_i32 = arith.constant 0 : i32
    %c0_i32_0 = arith.constant 0 : i32
    %c0_i32_1 = arith.constant 0 : i32
    return %c0_i32, %c0_i32_0 : i32, i32
  }
  func.func @transform_3(%arg0: i32) -> (i32, i32, i32) {
    %c0_i32 = arith.constant 0 : i32
    %c0_i32_0 = arith.constant 0 : i32
    %c0_i32_1 = arith.constant 0 : i32
    %c0_i32_2 = arith.constant 0 : i32
    return %c0_i32, %c0_i32_0, %c0_i32_1 : i32, i32, i32
  }
  func.func @transform_4(%arg0: i32) -> (i32, i32, i32) {
    %c0_i32 = arith.constant 0 : i32
    %c0_i32_0 = arith.constant 0 : i32
    %c0_i32_1 = arith.constant 0 : i32
    %c0_i32_2 = arith.constant 0 : i32
    return %c0_i32, %c0_i32_0, %c0_i32_1 : i32, i32, i32
  }
  func.func @transform_5(%arg0: i32) -> (i32, i32, i32) {
    %c0_i32 = arith.constant 0 : i32
    %c0_i32_0 = arith.constant 0 : i32
    %c0_i32_1 = arith.constant 0 : i32
    %c0_i32_2 = arith.constant 0 : i32
    return %c0_i32, %c0_i32_0, %c0_i32_1 : i32, i32, i32
  }
  func.func @transform_6(%arg0: i32) -> (i32, i32) {
    %c0_i32 = arith.constant 0 : i32
    %c0_i32_0 = arith.constant 0 : i32
    %c0_i32_1 = arith.constant 0 : i32
    return %c0_i32, %c0_i32_0 : i32, i32
  }
  func.func @transform_7(%arg0: i32) -> (i32, i32) {
    %c0_i32 = arith.constant 0 : i32
    %c0_i32_0 = arith.constant 0 : i32
    %c0_i32_1 = arith.constant 0 : i32
    return %c0_i32, %c0_i32_0 : i32, i32
  }
}

</mosaic_0001>

<bundles_post_ra>
// kernel: tpu_custom_call.1
= control target key start
LH: loop header
LB: loop body
LE: loop exit
PB: predicated region body
PF: predicated region fallthrough
CT: control target
= control target key end

     0   :  { %12 = vsyncpa [#allocation3], 0  ;;  %s2113_s0 = inlined_call_operand.hbm [shape: f32[8,32], index: 0, kind: input, shape index: {}]   ;;  %s2114_s1 = inlined_call_operand.hbm [shape: f32[32,1024], index: 1, kind: input, shape index: {}]   ;;  %s2115_s2 = inlined_call_operand.hbm [shape: f32[8,1024], index: 2, kind: input, shape index: {}]   ;;  %s2116_s3 = inlined_call_operand.hbm [shape: f32[2,512,256], index: 3, kind: input, shape index: {}]   ;;  %s2117_s4 = inlined_call_operand.hbm [shape: f32[2,8,256], index: 4, kind: input, shape index: {}]   ;;  %s2118_s5 = inlined_call_operand.hbm [shape: f32[2,256,128], index: 5, kind: input, shape index: {}]   ;;  %s2119_s6 = inlined_call_operand.hbm [shape: f32[8,256], index: 6, kind: input, shape index: {}]   ;;  %s2120_s7 = inlined_call_operand.hbm [shape: f32[8,256], index: 7, kind: output, shape index: {}]  }
   0x1   :  { %13 = vsyncpa [#allocation6], 0 }
   0x2   :  { %14 = vsyncpa [#allocation9], 0 }
   0x3   :  { %15 = vsyncpa [#allocation12], 0  ;;  %s32_s26 = sshll.u32 %s2114_s1, 4  ;;  %s33_s26 = int_to_ptr.hbm [resolvable:$true] %s32_s26 }
   0x4   :  { %16 = vsyncpa [#allocation4], 0  ;;  %s1800_s27 = smov [#allocation5]   ;;  %s56_s8 = sshll.u32 %s2116_s3, 4  ;;  %s57_s8 = int_to_ptr.hbm [resolvable:$true] %s56_s8 }
   0x5   :  { %s34_s28 = sshll.u32 %s1800_s27, 4  ;;  %s1801_s9 = smov 1024   ;;  %s35_s28 = int_to_ptr.vmem [resolvable:$true] %s34_s28 }
   0x6   :  { %s1802_s10 = smov 64   ;;  %s1803_s11 = smov [#allocation8]  }
   0x7   :  { %40 = dma.hbm_to_vmem [thread:$0]  %s33_s26, 4096, %s35_s28, [#allocation6], %s1801_s9, %s1801_s9, %s1802_s10  }
   0x8   :  { %s58_s12 = sshll.u32 %s1803_s11, 4  ;;  %s1804_s13 = smov 256   ;;  %s59_s12 = int_to_ptr.vmem [resolvable:$true] %s58_s12 }
   0x9   :  { %s1805_s14 = smov 16   ;;  %s82_s16 = sshll.u32 %s2118_s5, 4  ;;  %s83_s16 = int_to_ptr.hbm [resolvable:$true] %s82_s16 }
   0xa   :  { %64 = dma.hbm_to_vmem [thread:$0]  %s57_s8, 32768, %s59_s12, [#allocation9], %s1804_s13, %s1804_s13, %s1805_s14  }
   0xb   :  { %s1806_s17 = smov [#allocation11]   ;;  %s22_s20 = sshll.u32 %s2113_s0, 4  ;;  %s23_s20 = int_to_ptr.hbm [resolvable:$true] %s22_s20 }
   0xc   :  { %s84_s3 = sshll.u32 %s1806_s17, 4  ;;  %s1807_s21 = smov 128   ;;  %s85_s3 = int_to_ptr.vmem [resolvable:$true] %s84_s3 }
   0xd   :  { %s1808_s22 = smov 8   ;;  %s1809_s23 = smov [#allocation2]  }
   0xe   :  { %90 = dma.hbm_to_vmem [thread:$0]  %s83_s16, 8192, %s85_s3, [#allocation12], %s1807_s21, %s1807_s21, %s1808_s22  }
   0xf   :  { %s24_s24 = sshll.u32 %s1809_s23, 4  ;;  %s46_s27 = sshll.u32 %s2115_s2, 4  ;;  %s25_s24 = int_to_ptr.vmem [resolvable:$true] %s24_s24  ;;  %s47_s27 = int_to_ptr.hbm [resolvable:$true] %s46_s27 }
  0x10   :  { %27 = dma.hbm_to_vmem [thread:$0]  %s23_s20, 128, %s25_s24, [#allocation3]  }
  0x11   :  { %s69_s29 = sshll.u32 %s2117_s4, 4  ;;  %s1810_s30 = smov [#allocation7]   ;;  %s70_s29 = int_to_ptr.hbm [resolvable:$true] %s69_s29 }
  0x12   :  { %s48_s8 = sshll.u32 %s1810_s30, 4  ;;  %s1811_s0 = smov [#allocation10]   ;;  %s49_s8 = int_to_ptr.vmem [resolvable:$true] %s48_s8 }
  0x13   :  { %51 = dma.hbm_to_vmem [thread:$0]  %s47_s27, 1024, %s49_s8, [#allocation6]  }
  0x14   :  { %s71_s9 = sshll.u32 %s1811_s0, 4  ;;  %s96_s12 = sshll.u32 %s2119_s6, 4  ;;  %s72_s9 = int_to_ptr.vmem [resolvable:$true] %s71_s9  ;;  %s97_s12 = int_to_ptr.hbm [resolvable:$true] %s96_s12 }
  0x15   :  { %77 = dma.hbm_to_vmem [thread:$0]  %s70_s29, 512, %s72_s9, [#allocation9], %s1804_s13, %s1804_s13, %s1805_s14  }
  0x16   :  { %s1812_s2 = smov [#allocation13]  }
  0x17   :  { %s98_s1 = sshll.u32 %s1812_s2, 4  ;;  %s99_s1 = int_to_ptr.vmem [resolvable:$true] %s98_s1 }
  0x18   :  { %101 = dma.hbm_to_vmem [thread:$0]  %s97_s12, 256, %s99_s1, [#allocation12]  }
  0x19   :  { %1790 = dma.done.wait [#allocation3], 128  }
  0x1a   :  { %1791 = vsyncadd [#allocation3], 4294967168 }
  0x1b   :  { %1792 = dma.done.wait [#allocation6], 5120  }
  0x1c   :  { %1793 = vsyncadd [#allocation6], 4294962176 }
  0x1d   :  { %1794 = dma.done.wait [#allocation9], 33280  }
  0x1e   :  { %1795 = vsyncadd [#allocation9], 4294934016 }
  0x1f   :  { %1796 = dma.done.wait [#allocation12], 8448  }
  0x20   :  { %1797 = vsyncadd [#allocation12], 4294958848  ;;  %v163_v0 = vld [vmem:[#allocation5 + $0xc0] sm:$0xff]  ;;  %v164_v1 = vld [vmem:[#allocation5 + $0xc8] sm:$0xff]  ;;  %vm171_vm0 = vcmask 261120   ;;  %v1813_v37 = vmov 8.0  }
  0x21   :  { %v165_v2 = vld [vmem:[#allocation5 + $0xd0] sm:$0xff]  ;;  %187 = vmatpush.msra.mxu0 %v163_v0  ;;  %207 = vmatpush.msra.mxu1 %v164_v1  ;;  %v166_v3 = vld [vmem:[#allocation5 + $0xd8] sm:$0xff]  ;;  %v155_v4 = vld [vmem:[#allocation5 + $0x80] sm:$0xff]  ;;  %1572 = vrcp.f32 %v1813_v37  ;;  %s1814_s4 = smov [#allocation14]   ;;  %s1536_s15 = sshll.u32 %s2120_s7, 4  ;;  %s1537_s15 = int_to_ptr.hbm [resolvable:$true] %s1536_s15 }
  0x22   :  { %v156_v5 = vld [vmem:[#allocation5 + $0x88] sm:$0xff]  ;;  %227 = vmatpush.msra.mxu2 %v165_v2  ;;  %247 = vmatpush.msra.mxu3 %v166_v3  ;;  %v157_v6 = vld [vmem:[#allocation5 + $0x90] sm:$0xff]  ;;  %v158_v7 = vld [vmem:[#allocation5 + $0x98] sm:$0xff]  ;;  %s1534_s6 = sshll.u32 %s1814_s4, 4  ;;  %s1535_s6 = int_to_ptr.vmem [resolvable:$true] %s1534_s6 }
  0x23   :  { %v147_v8 = vld [vmem:[#allocation5 + $0x40] sm:$0xff]  ;;  %188 = vmatpush.msra.mxu0 %v155_v4  ;;  %208 = vmatpush.msra.mxu1 %v156_v5  ;;  %v148_v9 = vld [vmem:[#allocation5 + $0x48] sm:$0xff]  ;;  %v149_v10 = vld [vmem:[#allocation5 + $0x50] sm:$0xff] }
  0x24   :  { %v150_v11 = vld [vmem:[#allocation5 + $0x58] sm:$0xff]  ;;  %228 = vmatpush.msra.mxu2 %v157_v6  ;;  %248 = vmatpush.msra.mxu3 %v158_v7  ;;  %v139_v12 = vld [vmem:[#allocation5] sm:$0xff]  ;;  %v140_v13 = vld [vmem:[#allocation5 + $0x8] sm:$0xff] }
  0x25   :  { %189 = vmatpush.msra.mxu0 %v147_v8  ;;  %209 = vmatpush.msra.mxu1 %v148_v9  ;;  %v141_v14 = vld [vmem:[#allocation5 + $0x10] sm:$0xff]  ;;  %v142_v15 = vld [vmem:[#allocation5 + $0x18] sm:$0xff]  ;;  %v167_v17 = vld [vmem:[#allocation5 + $0xe0] sm:$0xff] }
  0x26   :  { %229 = vmatpush.msra.mxu2 %v149_v10  ;;  %249 = vmatpush.msra.mxu3 %v150_v11  ;;  %v130_v16 = vld [vmem:[#allocation2] sm:$0xff]  ;;  %v168_v18 = vld [vmem:[#allocation5 + $0xe8] sm:$0xff]  ;;  %v169_v19 = vld [vmem:[#allocation5 + $0xf0] sm:$0xff] }
  0x27   :  { %190 = vmatpush.msra.mxu0 %v139_v12  ;;  %210 = vmatpush.msra.mxu1 %v140_v13  ;;  %v170_v20 = vld [vmem:[#allocation5 + $0xf8] sm:$0xff]  ;;  %v159_v21 = vld [vmem:[#allocation5 + $0xa0] sm:$0xff]  ;;  %v160_v22 = vld [vmem:[#allocation5 + $0xa8] sm:$0xff]  ;;  %v1890_v47 = vpop.eup %1572 }
  0x28   :  { %230 = vmatpush.msra.mxu2 %v141_v14  ;;  %250 = vmatpush.msra.mxu3 %v142_v15  ;;  %v161_v23 = vld [vmem:[#allocation5 + $0xb0] sm:$0xff]  ;;  %v162_v24 = vld [vmem:[#allocation5 + $0xb8] sm:$0xff]  ;;  %v151_v25 = vld [vmem:[#allocation5 + $0x60] sm:$0xff]  ;;  %v384_v53 = vmul.f32 8.0, %v1890_v47  ;;  %vm388_vm1 = vweird.f32 %v1890_v47 }
  0x29   :  { %1549 = vmatmul.msk.f32.vlgmr.msra.gmra.mxu0 %vm171_vm0, %v130_v16  ;;  %1550 = vmatmul.msk.f32.vlgmr.msra.gmra.mxu1 %vm171_vm0, %v130_v16  ;;  %v152_v26 = vld [vmem:[#allocation5 + $0x68] sm:$0xff]  ;;  %v153_v27 = vld [vmem:[#allocation5 + $0x70] sm:$0xff]  ;;  %v154_v28 = vld [vmem:[#allocation5 + $0x78] sm:$0xff] }
  0x2a   :  { %1551 = vmatmul.msk.f32.vlgmr.msra.gmra.mxu2 %vm171_vm0, %v130_v16  ;;  %1552 = vmatmul.msk.f32.vlgmr.msra.gmra.mxu3 %vm171_vm0, %v130_v16  ;;  %v143_v29 = vld [vmem:[#allocation5 + $0x20] sm:$0xff]  ;;  %v144_v30 = vld [vmem:[#allocation5 + $0x28] sm:$0xff]  ;;  %v145_v31 = vld [vmem:[#allocation5 + $0x30] sm:$0xff]  ;;  %v385_v62 = vsub.f32 1.0, %v384_v53 }
  0x2b   :  { %267 = vmatpush.msrb.mxu0 %v167_v17  ;;  %287 = vmatpush.msrb.mxu1 %v168_v18  ;;  %v146_v32 = vld [vmem:[#allocation5 + $0x38] sm:$0xff]  ;;  %v678_v33 = vld [vmem:[#allocation8 + $0xf0] sm:$0xff]  ;;  %v676_v35 = vld [vmem:[#allocation8 + $0xe0] sm:$0xff] }
  0x2c   :  { %307 = vmatpush.msrb.mxu2 %v169_v19  ;;  %327 = vmatpush.msrb.mxu3 %v170_v20  ;;  %v710_v34 = vld [vmem:[#allocation8 + $0x1f0] sm:$0xff]  ;;  %v708_v36 = vld [vmem:[#allocation8 + $0x1e0] sm:$0xff]  ;;  %v386_v11 = vmul.f32 %v1890_v47, %v385_v62 }
  0x2d   :  { %268 = vmatpush.msrb.mxu0 %v159_v21  ;;  %288 = vmatpush.msrb.mxu1 %v160_v22  ;;  %v674_v38 = vld [vmem:[#allocation8 + $0xd0] sm:$0xff]  ;;  %v672_v40 = vld [vmem:[#allocation8 + $0xc0] sm:$0xff] }
  0x2e   :  { %308 = vmatpush.msrb.mxu2 %v161_v23  ;;  %328 = vmatpush.msrb.mxu3 %v162_v24  ;;  %v706_v39 = vld [vmem:[#allocation8 + $0x1d0] sm:$0xff]  ;;  %v704_v41 = vld [vmem:[#allocation8 + $0x1c0] sm:$0xff]  ;;  %v387_v24 = vadd.f32 %v1890_v47, %v386_v11 }
  0x2f   :  { %269 = vmatpush.msrb.mxu0 %v151_v25  ;;  %289 = vmatpush.msrb.mxu1 %v152_v26  ;;  %v742_v42 = vld [vmem:[#allocation8 + $0x2f0] sm:$0xff]  ;;  %v740_v46 = vld [vmem:[#allocation8 + $0x2e0] sm:$0xff] }
  0x30   :  { %309 = vmatpush.msrb.mxu2 %v153_v27  ;;  %329 = vmatpush.msrb.mxu3 %v154_v28  ;;  %v774_v43 = vld [vmem:[#allocation8 + $0x3f0] sm:$0xff]  ;;  %v772_v48 = vld [vmem:[#allocation8 + $0x3e0] sm:$0xff] }
  0x31   :  { %270 = vmatpush.msrb.mxu0 %v143_v29  ;;  %290 = vmatpush.msrb.mxu1 %v144_v30  ;;  %v670_v44 = vld [vmem:[#allocation8 + $0xb0] sm:$0xff]  ;;  %v668_v49 = vld [vmem:[#allocation8 + $0xa0] sm:$0xff] }
  0x32   :  { %1553 = vmatmul.msk.f32.vlgmr.msrb.gmra.mxu0 %vm171_vm0, %v130_v16  ;;  %1554 = vmatmul.msk.f32.vlgmr.msrb.gmra.mxu1 %vm171_vm0, %v130_v16  ;;  %v702_v45 = vld [vmem:[#allocation8 + $0x1b0] sm:$0xff]  ;;  %v700_v50 = vld [vmem:[#allocation8 + $0x1a0] sm:$0xff] }
  0x33   :  { %310 = vmatpush.msrb.mxu2 %v145_v31  ;;  %330 = vmatpush.msrb.mxu3 %v146_v32  ;;  %v738_v51 = vld [vmem:[#allocation8 + $0x2d0] sm:$0xff]  ;;  %v736_v56 = vld [vmem:[#allocation8 + $0x2c0] sm:$0xff] }
  0x34   :  { %1555 = vmatmul.msk.f32.vlgmr.msrb.gmra.mxu2 %vm171_vm0, %v130_v16  ;;  %1556 = vmatmul.msk.f32.vlgmr.msrb.gmra.mxu3 %vm171_vm0, %v130_v16  ;;  %v770_v52 = vld [vmem:[#allocation8 + $0x3d0] sm:$0xff]  ;;  %v768_v57 = vld [vmem:[#allocation8 + $0x3c0] sm:$0xff] }
  0x35   :  { %776 = vmatpush.msra.mxu0 %v678_v33  ;;  %796 = vmatpush.msra.mxu1 %v710_v34  ;;  %v666_v54 = vld [vmem:[#allocation8 + $0x90] sm:$0xff]  ;;  %v664_v58 = vld [vmem:[#allocation8 + $0x80] sm:$0xff] }
  0x36   :  { %816 = vmatpush.msra.mxu2 %v742_v42  ;;  %836 = vmatpush.msra.mxu3 %v774_v43  ;;  %v698_v55 = vld [vmem:[#allocation8 + $0x190] sm:$0xff]  ;;  %v696_v59 = vld [vmem:[#allocation8 + $0x180] sm:$0xff] }
  0x37   :  { %777 = vmatpush.msra.mxu0 %v676_v35  ;;  %797 = vmatpush.msra.mxu1 %v708_v36  ;;  %v734_v60 = vld [vmem:[#allocation8 + $0x2b0] sm:$0xff]  ;;  %v732_v1 = vld [vmem:[#allocation8 + $0x2a0] sm:$0xff] }
  0x38   :  { %817 = vmatpush.msra.mxu2 %v740_v46  ;;  %837 = vmatpush.msra.mxu3 %v772_v48  ;;  %v766_v61 = vld [vmem:[#allocation8 + $0x3b0] sm:$0xff]  ;;  %v764_v2 = vld [vmem:[#allocation8 + $0x3a0] sm:$0xff] }
  0x39   :  { %778 = vmatpush.msra.mxu0 %v674_v38  ;;  %798 = vmatpush.msra.mxu1 %v706_v39  ;;  %v662_v63 = vld [vmem:[#allocation8 + $0x70] sm:$0xff]  ;;  %v660_v5 = vld [vmem:[#allocation8 + $0x60] sm:$0xff] }
  0x3a   :  { %818 = vmatpush.msra.mxu2 %v738_v51  ;;  %838 = vmatpush.msra.mxu3 %v770_v52  ;;  %v694_v0 = vld [vmem:[#allocation8 + $0x170] sm:$0xff]  ;;  %v692_v6 = vld [vmem:[#allocation8 + $0x160] sm:$0xff] }
  0x3b   :  { %779 = vmatpush.msra.mxu0 %v672_v40  ;;  %799 = vmatpush.msra.mxu1 %v704_v41  ;;  %v730_v7 = vld [vmem:[#allocation8 + $0x290] sm:$0xff]  ;;  %v728_v14 = vld [vmem:[#allocation8 + $0x280] sm:$0xff]  ;;  %v1913_v41 = vsel %vm388_vm1, %v1890_v47, %v387_v24 }
  0x3c   :  { %819 = vmatpush.msra.mxu2 %v736_v56  ;;  %839 = vmatpush.msra.mxu3 %v768_v57  ;;  %v762_v10 = vld [vmem:[#allocation8 + $0x390] sm:$0xff]  ;;  %v760_v17 = vld [vmem:[#allocation8 + $0x380] sm:$0xff] }
  0x3d   :  { %780 = vmatpush.msra.mxu0 %v670_v44  ;;  %800 = vmatpush.msra.mxu1 %v702_v45  ;;  %v658_v12 = vld [vmem:[#allocation8 + $0x50] sm:$0xff]  ;;  %v656_v18 = vld [vmem:[#allocation8 + $0x40] sm:$0xff] }
  0x3e   :  { %820 = vmatpush.msra.mxu2 %v734_v60  ;;  %840 = vmatpush.msra.mxu3 %v766_v61  ;;  %v690_v13 = vld [vmem:[#allocation8 + $0x150] sm:$0xff]  ;;  %v688_v19 = vld [vmem:[#allocation8 + $0x140] sm:$0xff] }
  0x3f   :  { %781 = vmatpush.msra.mxu0 %v668_v49  ;;  %801 = vmatpush.msra.mxu1 %v700_v50  ;;  %v726_v20 = vld [vmem:[#allocation8 + $0x270] sm:$0xff]  ;;  %v724_v27 = vld [vmem:[#allocation8 + $0x260] sm:$0xff] }
  0x40   :  { %821 = vmatpush.msra.mxu2 %v732_v1  ;;  %841 = vmatpush.msra.mxu3 %v764_v2  ;;  %v758_v23 = vld [vmem:[#allocation8 + $0x370] sm:$0xff]  ;;  %v756_v32 = vld [vmem:[#allocation8 + $0x360] sm:$0xff]  ;;  %v677_v2 = vld [vmem:[#allocation8 + $0xe8] sm:$0xff] }
  0x41   :  { %782 = vmatpush.msra.mxu0 %v666_v54  ;;  %802 = vmatpush.msra.mxu1 %v698_v55  ;;  %v654_v25 = vld [vmem:[#allocation8 + $0x30] sm:$0xff]  ;;  %v652_v35 = vld [vmem:[#allocation8 + $0x20] sm:$0xff] }
  0x42   :  { %822 = vmatpush.msra.mxu2 %v730_v7  ;;  %842 = vmatpush.msra.mxu3 %v762_v10  ;;  %v686_v26 = vld [vmem:[#allocation8 + $0x130] sm:$0xff]  ;;  %v684_v36 = vld [vmem:[#allocation8 + $0x120] sm:$0xff] }
  0x43   :  { %783 = vmatpush.msra.mxu0 %v664_v58  ;;  %803 = vmatpush.msra.mxu1 %v696_v59  ;;  %v722_v37 = vld [vmem:[#allocation8 + $0x250] sm:$0xff]  ;;  %v720_v46 = vld [vmem:[#allocation8 + $0x240] sm:$0xff]  ;;  %v679_v58 = vld [vmem:[#allocation8 + $0xf8] sm:$0xff] }
  0x44   :  { %823 = vmatpush.msra.mxu2 %v728_v14  ;;  %843 = vmatpush.msra.mxu3 %v760_v17  ;;  %v754_v40 = vld [vmem:[#allocation8 + $0x350] sm:$0xff]  ;;  %v752_v50 = vld [vmem:[#allocation8 + $0x340] sm:$0xff]  ;;  %v711_v59 = vld [vmem:[#allocation8 + $0x1f8] sm:$0xff] }
  0x45   :  { %784 = vmatpush.msra.mxu0 %v662_v63  ;;  %804 = vmatpush.msra.mxu1 %v694_v0  ;;  %v650_v44 = vld [vmem:[#allocation8 + $0x10] sm:$0xff]  ;;  %v648_v47 = vld [vmem:[#allocation8] sm:$0xff] }
  0x46   :  { %824 = vmatpush.msra.mxu2 %v726_v20  ;;  %844 = vmatpush.msra.mxu3 %v758_v23  ;;  %v682_v45 = vld [vmem:[#allocation8 + $0x110] sm:$0xff]  ;;  %v680_v53 = vld [vmem:[#allocation8 + $0x100] sm:$0xff]  ;;  %v673_v20 = vld [vmem:[#allocation8 + $0xc8] sm:$0xff] }
  0x47   :  { %785 = vmatpush.msra.mxu0 %v660_v5  ;;  %805 = vmatpush.msra.mxu1 %v692_v6  ;;  %v718_v54 = vld [vmem:[#allocation8 + $0x230] sm:$0xff]  ;;  %v716_v62 = vld [vmem:[#allocation8 + $0x220] sm:$0xff]  ;;  %v709_v5 = vld [vmem:[#allocation8 + $0x1e8] sm:$0xff] }
  0x48   :  { %825 = vmatpush.msra.mxu2 %v724_v27  ;;  %845 = vmatpush.msra.mxu3 %v756_v32  ;;  %v750_v57 = vld [vmem:[#allocation8 + $0x330] sm:$0xff]  ;;  %v748_v63 = vld [vmem:[#allocation8 + $0x320] sm:$0xff] }
  0x49   :  { %786 = vmatpush.msra.mxu0 %v658_v12  ;;  %806 = vmatpush.msra.mxu1 %v690_v13  ;;  %v675_v12 = vld [vmem:[#allocation8 + $0xd8] sm:$0xff]  ;;  %v744_v17 = vld [vmem:[#allocation8 + $0x300] sm:$0xff] }
  0x4a   :  { %826 = vmatpush.msra.mxu2 %v722_v37  ;;  %846 = vmatpush.msra.mxu3 %v754_v40  ;;  %v707_v13 = vld [vmem:[#allocation8 + $0x1d8] sm:$0xff] }
  0x4b   :  { %787 = vmatpush.msra.mxu0 %v656_v18  ;;  %807 = vmatpush.msra.mxu1 %v688_v19  ;;  %v739_v40 = vld [vmem:[#allocation8 + $0x2d8] sm:$0xff] }
  0x4c   :  { %827 = vmatpush.msra.mxu2 %v720_v46  ;;  %847 = vmatpush.msra.mxu3 %v752_v50  ;;  %v737_v50 = vld [vmem:[#allocation8 + $0x2c8] sm:$0xff] }
  0x4d   :  { %788 = vmatpush.msra.mxu0 %v654_v25  ;;  %808 = vmatpush.msra.mxu1 %v686_v26  ;;  %v775_v25 = vld [vmem:[#allocation8 + $0x3f8] sm:$0xff] }
  0x4e   :  { %828 = vmatpush.msra.mxu2 %v718_v54  ;;  %848 = vmatpush.msra.mxu3 %v750_v57  ;;  %v665_v57 = vld [vmem:[#allocation8 + $0x88] sm:$0xff] }
  0x4f   :  { %789 = vmatpush.msra.mxu0 %v652_v35  ;;  %809 = vmatpush.msra.mxu1 %v684_v36  ;;  %v773_v35 = vld [vmem:[#allocation8 + $0x3e8] sm:$0xff] }
  0x50   :  { %829 = vmatpush.msra.mxu2 %v716_v62  ;;  %849 = vmatpush.msra.mxu3 %v748_v63  ;;  %v767_v62 = vld [vmem:[#allocation8 + $0x3b8] sm:$0xff] }
  0x51   :  { %790 = vmatpush.msra.mxu0 %v650_v44  ;;  %810 = vmatpush.msra.mxu1 %v682_v45  ;;  %v771_v44 = vld [vmem:[#allocation8 + $0x3d8] sm:$0xff] }
  0x53   :  { %791 = vmatpush.msra.mxu0 %v648_v47  ;;  %811 = vmatpush.msra.mxu1 %v680_v53  ;;  %v769_v47 = vld [vmem:[#allocation8 + $0x3c8] sm:$0xff] }
  0x55   :  { %856 = vmatpush.msrb.mxu0 %v679_v58  ;;  %876 = vmatpush.msrb.mxu1 %v711_v59 }
  0x57   :  { %857 = vmatpush.msrb.mxu0 %v677_v2  ;;  %877 = vmatpush.msrb.mxu1 %v709_v5  ;;  %v695_v2 = vld [vmem:[#allocation8 + $0x178] sm:$0xff]  ;;  %v733_v5 = vld [vmem:[#allocation8 + $0x2a8] sm:$0xff] }
  0x59   :  { %858 = vmatpush.msrb.mxu0 %v675_v12  ;;  %878 = vmatpush.msrb.mxu1 %v707_v13  ;;  %v693_v12 = vld [vmem:[#allocation8 + $0x168] sm:$0xff]  ;;  %v731_v13 = vld [vmem:[#allocation8 + $0x298] sm:$0xff] }
  0x5b   :  { %859 = vmatpush.msrb.mxu0 %v673_v20  ;;  %v691_v20 = vld [vmem:[#allocation8 + $0x158] sm:$0xff] }
  0xa6   :  { %v1893_v3 = vpop.f32.mrf.mxu0  ;;  %v1895_v4 = vpop.f32.mrf.mxu1 }
  0xa7   :  { %v335_v8 = vrot.slane %v1893_v3, 4  ;;  %v341_v9 = vrot.slane %v1895_v4, 4 }
  0xa9   :  { %v336_v15 = vadd.f32 %v335_v8, %v1893_v3  ;;  %v342_v16 = vadd.f32 %v341_v9, %v1895_v4  ;;  %v714_v8 = vld [vmem:[#allocation8 + $0x210] sm:$0xff] }
  0xaa   :  { %v746_v9 = vld [vmem:[#allocation8 + $0x310] sm:$0xff]  ;;  %830 = vmatpush.msra.mxu2 %v714_v8  ;;  %v765_v8 = vld [vmem:[#allocation8 + $0x3a8] sm:$0xff] }
  0xab   :  { %v337_v21 = vrot.slane %v336_v15, 2  ;;  %v343_v22 = vrot.slane %v342_v16, 2  ;;  %850 = vmatpush.msra.mxu3 %v746_v9 }
  0xad   :  { %v338_v28 = vadd.f32 %v337_v21, %v336_v15  ;;  %v344_v29 = vadd.f32 %v343_v22, %v342_v16  ;;  %v1904_v30 = vpop.f32.mrf.mxu2  ;;  %v1906_v31 = vpop.f32.mrf.mxu3  ;;  %v712_v16 = vld [vmem:[#allocation8 + $0x200] sm:$0xff]  ;;  %v705_v21 = vld [vmem:[#allocation8 + $0x1c8] sm:$0xff]  ;;  %v743_v22 = vld [vmem:[#allocation8 + $0x2f8] sm:$0xff]  ;;  %851 = vmatpush.msra.mxu3 %v744_v17 }
  0xae   :  { %v347_v33 = vrot.slane %v1904_v30, 4  ;;  %v353_v34 = vrot.slane %v1906_v31, 4  ;;  %831 = vmatpush.msra.mxu2 %v712_v16  ;;  %879 = vmatpush.msrb.mxu1 %v705_v21  ;;  %v763_v16 = vld [vmem:[#allocation8 + $0x398] sm:$0xff] }
  0xaf   :  { %v339_v38 = vrot.slane %v338_v28, 1  ;;  %v345_v39 = vrot.slane %v344_v29, 1  ;;  %916 = vmatpush.msrb.mxu3 %v775_v25  ;;  %v729_v25 = vld [vmem:[#allocation8 + $0x288] sm:$0xff] }
  0xb0   :  { %v348_v42 = vadd.f32 %v347_v33, %v1904_v30  ;;  %v354_v43 = vadd.f32 %v353_v34, %v1906_v31  ;;  %896 = vmatpush.msrb.mxu2 %v743_v22  ;;  %v741_v34 = vld [vmem:[#allocation8 + $0x2e8] sm:$0xff] }
  0xb1   :  { %v340_v48 = vadd.f32 %v339_v38, %v338_v28  ;;  %v346_v49 = vadd.f32 %v345_v39, %v344_v29  ;;  %v671_v28 = vld [vmem:[#allocation8 + $0xb8] sm:$0xff]  ;;  %v669_v38 = vld [vmem:[#allocation8 + $0xa8] sm:$0xff]  ;;  %917 = vmatpush.msrb.mxu3 %v773_v35 }
  0xb2   :  { %v349_v51 = vrot.slane %v348_v42, 2  ;;  %v355_v52 = vrot.slane %v354_v43, 2  ;;  %v703_v29 = vld [vmem:[#allocation8 + $0x1b8] sm:$0xff]  ;;  %860 = vmatpush.msrb.mxu0 %v671_v28  ;;  %v701_v39 = vld [vmem:[#allocation8 + $0x1a8] sm:$0xff]  ;;  %897 = vmatpush.msrb.mxu2 %v741_v34 }
  0xb3   :  { %v1918_v55 = vmul.f32 %v1913_v41, %v340_v48  ;;  %v1921_v56 = vmul.f32 %v1913_v41, %v346_v49  ;;  %880 = vmatpush.msrb.mxu1 %v703_v29  ;;  %v667_v48 = vld [vmem:[#allocation8 + $0x98] sm:$0xff]  ;;  %918 = vmatpush.msrb.mxu3 %v771_v44  ;;  %v689_v28 = vld [vmem:[#allocation8 + $0x148] sm:$0xff] }
  0xb4   :  { %v350_v60 = vadd.f32 %v349_v51, %v348_v42  ;;  %v356_v61 = vadd.f32 %v355_v52, %v354_v43  ;;  %861 = vmatpush.msrb.mxu0 %v669_v38  ;;  %v699_v49 = vld [vmem:[#allocation8 + $0x198] sm:$0xff]  ;;  %898 = vmatpush.msrb.mxu2 %v739_v40  ;;  %v757_v40 = vld [vmem:[#allocation8 + $0x368] sm:$0xff] }
  0xb5   :  { %v398_v0 = vsub.f32 %v1893_v3, %v1918_v55  ;;  %v399_v1 = vsub.f32 %v1895_v4, %v1921_v56  ;;  %881 = vmatpush.msrb.mxu1 %v701_v39  ;;  %919 = vmatpush.msrb.mxu3 %v769_v47  ;;  %v727_v29 = vld [vmem:[#allocation8 + $0x278] sm:$0xff]  ;;  %v753_v47 = vld [vmem:[#allocation8 + $0x348] sm:$0xff] }
  0xb6   :  { %v351_v6 = vrot.slane %v350_v60, 1  ;;  %v357_v7 = vrot.slane %v356_v61, 1  ;;  %862 = vmatpush.msrb.mxu0 %v667_v48  ;;  %899 = vmatpush.msrb.mxu2 %v737_v50  ;;  %v759_v34 = vld [vmem:[#allocation8 + $0x378] sm:$0xff] }
  0xb7   :  { %v406_v10 = vmul.f32 %v398_v0, %v398_v0  ;;  %v407_v11 = vmul.f32 %v399_v1, %v399_v1  ;;  %882 = vmatpush.msrb.mxu1 %v699_v49  ;;  %v663_v1 = vld [vmem:[#allocation8 + $0x78] sm:$0xff]  ;;  %920 = vmatpush.msrb.mxu3 %v767_v62 }
  0xb8   :  { %v352_v14 = vadd.f32 %v351_v6, %v350_v60  ;;  %v358_v15 = vadd.f32 %v357_v7, %v356_v61  ;;  %v697_v60 = vld [vmem:[#allocation8 + $0x188] sm:$0xff]  ;;  %v735_v61 = vld [vmem:[#allocation8 + $0x2b8] sm:$0xff]  ;;  %863 = vmatpush.msrb.mxu0 %v665_v57 }
  0xb9   :  { %v414_v18 = vrot.slane %v406_v10, 4  ;;  %v420_v19 = vrot.slane %v407_v11, 4  ;;  %883 = vmatpush.msrb.mxu1 %v697_v60  ;;  %900 = vmatpush.msrb.mxu2 %v735_v61  ;;  %v655_v35 = vld [vmem:[#allocation8 + $0x38] sm:$0xff] }
  0xba   :  { %v1928_v23 = vmul.f32 %v1913_v41, %v352_v14  ;;  %v1931_v24 = vmul.f32 %v1913_v41, %v358_v15  ;;  %864 = vmatpush.msrb.mxu0 %v663_v1  ;;  %921 = vmatpush.msrb.mxu3 %v765_v8  ;;  %v723_v44 = vld [vmem:[#allocation8 + $0x258] sm:$0xff]  ;;  %v749_v1 = vld [vmem:[#allocation8 + $0x328] sm:$0xff] }
  0xbb   :  { %v415_v26 = vadd.f32 %v414_v18, %v406_v10  ;;  %v421_v27 = vadd.f32 %v420_v19, %v407_v11  ;;  %884 = vmatpush.msrb.mxu1 %v695_v2  ;;  %v661_v11 = vld [vmem:[#allocation8 + $0x68] sm:$0xff]  ;;  %901 = vmatpush.msrb.mxu2 %v733_v5  ;;  %v659_v19 = vld [vmem:[#allocation8 + $0x58] sm:$0xff] }
  0xbc   :  { %v400_v32 = vsub.f32 %v1904_v30, %v1928_v23  ;;  %v401_v33 = vsub.f32 %v1906_v31, %v1931_v24  ;;  %865 = vmatpush.msrb.mxu0 %v661_v11  ;;  %922 = vmatpush.msrb.mxu3 %v763_v16  ;;  %v755_v48 = vld [vmem:[#allocation8 + $0x358] sm:$0xff] }
  0xbd   :  { %v416_v36 = vrot.slane %v415_v26, 2  ;;  %v422_v37 = vrot.slane %v421_v27, 2  ;;  %885 = vmatpush.msrb.mxu1 %v693_v12  ;;  %902 = vmatpush.msrb.mxu2 %v731_v13  ;;  %v651_v49 = vld [vmem:[#allocation8 + $0x18] sm:$0xff]  ;;  %v713_v13 = vld [vmem:[#allocation8 + $0x208] sm:$0xff] }
  0xbe   :  { %v408_v42 = vmul.f32 %v400_v32, %v400_v32  ;;  %v409_v43 = vmul.f32 %v401_v33, %v401_v33  ;;  %866 = vmatpush.msrb.mxu0 %v659_v19  ;;  %v719_v61 = vld [vmem:[#allocation8 + $0x238] sm:$0xff] }
  0xbf   :  { %v417_v45 = vadd.f32 %v416_v36, %v415_v26  ;;  %v423_v46 = vadd.f32 %v422_v37, %v421_v27  ;;  %v761_v26 = vld [vmem:[#allocation8 + $0x388] sm:$0xff]  ;;  %886 = vmatpush.msrb.mxu1 %v691_v20  ;;  %903 = vmatpush.msrb.mxu2 %v729_v25  ;;  %v687_v36 = vld [vmem:[#allocation8 + $0x138] sm:$0xff]  ;;  %v1967_v25 = vpop.f32.mrf.mxu0 }
  0xc0   :  { %v426_v51 = vrot.slane %v408_v42, 4  ;;  %v432_v52 = vrot.slane %v409_v43, 4  ;;  %v657_v27 = vld [vmem:[#allocation8 + $0x48] sm:$0xff]  ;;  %923 = vmatpush.msrb.mxu3 %v761_v26  ;;  %v751_v62 = vld [vmem:[#allocation8 + $0x338] sm:$0xff] }
  0xc1   :  { %v418_v53 = vrot.slane %v417_v45, 1  ;;  %v424_v54 = vrot.slane %v423_v46, 1  ;;  %867 = vmatpush.msrb.mxu0 %v657_v27  ;;  %887 = vmatpush.msrb.mxu1 %v689_v28  ;;  %v725_v37 = vld [vmem:[#allocation8 + $0x268] sm:$0xff] }
  0xc2   :  { %v427_v58 = vadd.f32 %v426_v51, %v408_v42  ;;  %v433_v59 = vadd.f32 %v432_v52, %v409_v43  ;;  %904 = vmatpush.msrb.mxu2 %v727_v29  ;;  %924 = vmatpush.msrb.mxu3 %v759_v34  ;;  %v653_v42 = vld [vmem:[#allocation8 + $0x28] sm:$0xff]  ;;  %v683_v51 = vld [vmem:[#allocation8 + $0x118] sm:$0xff] }
  0xc3   :  { %v419_v63 = vadd.f32 %v418_v53, %v417_v45  ;;  %v425_v0 = vadd.f32 %v424_v54, %v423_v46  ;;  %868 = vmatpush.msrb.mxu0 %v655_v35  ;;  %888 = vmatpush.msrb.mxu1 %v687_v36  ;;  %v685_v43 = vld [vmem:[#allocation8 + $0x128] sm:$0xff] }
  0xc4   :  { %v428_v6 = vrot.slane %v427_v58, 2  ;;  %v434_v7 = vrot.slane %v433_v59, 2  ;;  %905 = vmatpush.msrb.mxu2 %v725_v37  ;;  %925 = vmatpush.msrb.mxu3 %v757_v40  ;;  %v721_v52 = vld [vmem:[#allocation8 + $0x248] sm:$0xff] }
  0xc5   :  { %v462_v9 = vmul.f32 %v419_v63, %v1913_v41  ;;  %v463_v10 = vmul.f32 %v425_v0, %v1913_v41  ;;  %869 = vmatpush.msrb.mxu0 %v653_v42  ;;  %889 = vmatpush.msrb.mxu1 %v685_v43  ;;  %v717_v0 = vld [vmem:[#allocation8 + $0x228] sm:$0xff]  ;;  %v133_v43 = vld [vmem:[#allocation7 + $0x10] sm:$0xff] }
  0xc6   :  { %v429_v14 = vadd.f32 %v428_v6, %v427_v58  ;;  %v435_v15 = vadd.f32 %v434_v7, %v433_v59  ;;  %906 = vmatpush.msrb.mxu2 %v723_v44  ;;  %926 = vmatpush.msrb.mxu3 %v755_v48  ;;  %v649_v58 = vld [vmem:[#allocation8 + $0x8] sm:$0xff]  ;;  %v715_v6 = vld [vmem:[#allocation8 + $0x218] sm:$0xff] }
  0xc7   :  { %v1939_v17 = vadd.f32 1e-05, %v462_v9  ;;  %v1941_v18 = vadd.f32 1e-05, %v463_v10  ;;  %870 = vmatpush.msrb.mxu0 %v651_v49  ;;  %890 = vmatpush.msrb.mxu1 %v683_v51  ;;  %v681_v59 = vld [vmem:[#allocation8 + $0x108] sm:$0xff]  ;;  %v747_v7 = vld [vmem:[#allocation8 + $0x318] sm:$0xff] }
  0xc8   :  { %v430_v21 = vrot.slane %v429_v14, 1  ;;  %v436_v22 = vrot.slane %v435_v15, 1  ;;  %907 = vmatpush.msrb.mxu2 %v721_v52  ;;  %927 = vmatpush.msrb.mxu3 %v753_v47  ;;  %v132_v20 = vld [vmem:[#allocation7 + $0x8] sm:$0xff] }
  0xc9   :  { %1574 = vrsqrt.f32 %v1939_v17  ;;  %871 = vmatpush.msrb.mxu0 %v649_v58  ;;  %891 = vmatpush.msrb.mxu1 %v681_v59  ;;  %vm484_vm4 = vweird.f32 %v1939_v17  ;;  %vm494_vm6 = vweird.f32 %v1941_v18 }
  0xca   :  { %1576 = vrsqrt.f32 %v1941_v18  ;;  %v431_v32 = vadd.f32 %v430_v21, %v429_v14  ;;  %v437_v33 = vadd.f32 %v436_v22, %v435_v15  ;;  %908 = vmatpush.msrb.mxu2 %v719_v61  ;;  %928 = vmatpush.msrb.mxu3 %v751_v62  ;;  %v745_v14 = vld [vmem:[#allocation8 + $0x308] sm:$0xff]  ;;  %v131_v15 = vld [vmem:[#allocation7] sm:$0xff] }
  0xcc   :  { %v464_v38 = vmul.f32 %v431_v32, %v1913_v41  ;;  %v465_v39 = vmul.f32 %v437_v33, %v1913_v41  ;;  %909 = vmatpush.msrb.mxu2 %v717_v0  ;;  %929 = vmatpush.msrb.mxu3 %v749_v1 }
  0xce   :  { %v1947_v45 = vadd.f32 1e-05, %v464_v38  ;;  %v1949_v46 = vadd.f32 1e-05, %v465_v39  ;;  %910 = vmatpush.msrb.mxu2 %v715_v6  ;;  %930 = vmatpush.msrb.mxu3 %v747_v7 }
  0xcf   :  { %v1951_v50 = vpop.eup %1574 }
  0xd0   :  { %v1577_v53 = vpop.eup %1576  ;;  %v479_v54 = vmul.f32 %v1951_v50, %v1939_v17  ;;  %1578 = vrsqrt.f32 %v1947_v45  ;;  %vm485_vm2 = vweird.f32 %v1951_v50  ;;  %911 = vmatpush.msrb.mxu2 %v713_v13  ;;  %931 = vmatpush.msrb.mxu3 %v745_v14  ;;  %v359_v17 = vrot.slane %v1967_v25, 4 }
  0xd1   :  { %v489_v57 = vmul.f32 %v1577_v53, %v1941_v18  ;;  %1580 = vrsqrt.f32 %v1949_v46  ;;  %vm495_vm3 = vweird.f32 %v1577_v53  ;;  %vm486_vm5 = vmor %vm484_vm4, %vm485_vm2  ;;  %vm504_vm8 = vweird.f32 %v1947_v45 }
  0xd2   :  { %v480_v60 = vmul.f32 %v1951_v50, %v479_v54  ;;  %vm496_vm7 = vmor %vm494_vm6, %vm495_vm3  ;;  %v360_v35 = vadd.f32 %v359_v17, %v1967_v25  ;;  %vm514_vm11 = vweird.f32 %v1949_v46 }
  0xd3   :  { %v490_v63 = vmul.f32 %v1577_v53, %v489_v57 }
  0xd4   :  { %v481_v2 = vmul.f32 0.5, %v480_v60  ;;  %v361_v39 = vrot.slane %v360_v35, 2 }
  0xd5   :  { %v491_v5 = vmul.f32 0.5, %v490_v63 }
  0xd6   :  { %v1579_v8 = vpop.eup %1578  ;;  %v482_v9 = vsub.f32 1.5, %v481_v2  ;;  %v362_v51 = vadd.f32 %v361_v39, %v360_v35  ;;  %v1120_v39 = vld [vmem:[#allocation8 + $0x4f0] sm:$0xff] }
  0xd7   :  { %v1581_v10 = vpop.eup %1580  ;;  %v492_v11 = vsub.f32 1.5, %v491_v5  ;;  %v499_v12 = vmul.f32 %v1579_v8, %v1947_v45  ;;  %vm505_vm9 = vweird.f32 %v1579_v8 }
  0xd8   :  { %v483_v16 = vmul.f32 %v1951_v50, %v482_v9  ;;  %v509_v19 = vmul.f32 %v1581_v10, %v1949_v46  ;;  %vm515_vm10 = vweird.f32 %v1581_v10  ;;  %vm506_vm12 = vmor %vm504_vm8, %vm505_vm9  ;;  %v363_v54 = vrot.slane %v362_v51, 1 }
  0xd9   :  { %v493_v21 = vmul.f32 %v1577_v53, %v492_v11  ;;  %v500_v22 = vmul.f32 %v1579_v8, %v499_v12  ;;  %vm516_vm13 = vmor %vm514_vm11, %vm515_vm10 }
  0xda   :  { %v487_v26 = vsel %vm486_vm5, %v1951_v50, %v483_v16  ;;  %v510_v27 = vmul.f32 %v1581_v10, %v509_v19  ;;  %v134_v50 = vld [vmem:[#allocation7 + $0x18] sm:$0xff]  ;;  %v364_v62 = vadd.f32 %v363_v54, %v362_v51  ;;  %v1148_v51 = vld [vmem:[#allocation8 + $0x5d0] sm:$0xff]  ;;  %v135_v54 = vld [vmem:[#allocation7 + $0x20] sm:$0xff] }
  0xdb   :  { %v558_v28 = vmul.f32 %v487_v26, %v131_v15  ;;  %v497_v29 = vsel %vm496_vm7, %v1577_v53, %v493_v21  ;;  %v501_v32 = vmul.f32 0.5, %v500_v22 }
  0xdc   :  { %v559_v33 = vmul.f32 %v497_v29, %v132_v20  ;;  %v511_v34 = vmul.f32 0.5, %v510_v27  ;;  %v1983_v6 = vmul.f32 %v1913_v41, %v364_v62  ;;  %v1142_v62 = vld [vmem:[#allocation8 + $0x5a0] sm:$0xff] }
  0xdd   :  { %v566_v18 = vmul.f32 %v558_v28, %v1918_v55  ;;  %v502_v36 = vsub.f32 1.5, %v501_v32  ;;  %v606_v42 = vperm.slane %v558_v28, 0  ;;  %v1989_v28 = vpop.f32.mrf.mxu1 }
  0xde   :  { %v567_v37 = vmul.f32 %v559_v33, %v1921_v56  ;;  %v512_v38 = vsub.f32 1.5, %v511_v34  ;;  %v607_v49 = vperm.slane %v559_v33, 0  ;;  %v365_v29 = vrot.slane %v1989_v28, 4 }
  0xdf   :  { %v582_v40 = vrot.slane %v566_v18, 7  ;;  %v503_v44 = vmul.f32 %v1579_v8, %v502_v36  ;;  %v614_v57 = vmul.f32 %v606_v42, %v1893_v3 }
  0xe0   :  { %v583_v48 = vrot.slane %v567_v37, 7  ;;  %v513_v55 = vmul.f32 %v1581_v10, %v512_v38  ;;  %v615_v46 = vmul.f32 %v607_v49, %v1895_v4  ;;  %v402_v4 = vsub.f32 %v1967_v25, %v1983_v6 }
  0xe1   :  { %v598_v52 = vsub.f32 %v131_v15, %v582_v40  ;;  %v507_v45 = vsel %vm506_vm12, %v1579_v8, %v503_v44  ;;  %v366_v33 = vadd.f32 %v365_v29, %v1989_v28  ;;  %v1152_v40 = vld [vmem:[#allocation8 + $0x5f0] sm:$0xff]  ;;  %v1118_v44 = vld [vmem:[#allocation8 + $0x4e0] sm:$0xff] }
  0xe2   :  { %v599_v56 = vsub.f32 %v132_v20, %v583_v48  ;;  %v560_v47 = vmul.f32 %v507_v45, %v133_v43  ;;  %v517_v53 = vsel %vm516_vm13, %v1581_v10, %v513_v55  ;;  %v1150_v48 = vld [vmem:[#allocation8 + $0x5e0] sm:$0xff]  ;;  %v1116_v55 = vld [vmem:[#allocation8 + $0x4d0] sm:$0xff] }
  0xe3   :  { %v622_v58 = vperm.slane %v598_v52, 1  ;;  %v561_v59 = vmul.f32 %v517_v53, %v134_v50  ;;  %v367_v34 = vrot.slane %v366_v33, 2 }
  0xe4   :  { %v623_v60 = vperm.slane %v599_v56, 1  ;;  %v568_v61 = vmul.f32 %v560_v47, %v1928_v23  ;;  %v608_v5 = vperm.slane %v560_v47, 0  ;;  %v1114_v56 = vld [vmem:[#allocation8 + $0x4c0] sm:$0xff] }
  0xe5   :  { %v630_v63 = vadd.f32 %v622_v58, %v614_v57  ;;  %v569_v0 = vmul.f32 %v561_v59, %v1931_v24  ;;  %v609_v8 = vperm.slane %v561_v59, 0  ;;  %v410_v24 = vmul.f32 %v402_v4, %v402_v4  ;;  %v1146_v47 = vld [vmem:[#allocation8 + $0x5c0] sm:$0xff]  ;;  %v1112_v58 = vld [vmem:[#allocation8 + $0x4b0] sm:$0xff] }
  0xe6   :  { %v631_v1 = vadd.f32 %v623_v60, %v615_v46  ;;  %v584_v2 = vrot.slane %v568_v61, 7  ;;  %v616_v23 = vmul.f32 %v608_v5, %v1904_v30  ;;  %v368_v35 = vadd.f32 %v367_v34, %v366_v33  ;;  %v1144_v59 = vld [vmem:[#allocation8 + $0x5b0] sm:$0xff]  ;;  %v1110_v61 = vld [vmem:[#allocation8 + $0x4a0] sm:$0xff] }
  0xe7   :  { %v585_v7 = vrot.slane %v569_v0, 7  ;;  %v638_v3 = vmax.f32 %v630_v63, 0.0  ;;  %v617_v13 = vmul.f32 %v609_v8, %v1906_v31  ;;  %v438_v16 = vrot.slane %v410_v24, 4  ;;  %v1106_v8 = vld [vmem:[#allocation8 + $0x480] sm:$0xff]  ;;  %v1104_v4 = vld [vmem:[#allocation8 + $0x470] sm:$0xff] }
  0xe8   :  { %v600_v9 = vsub.f32 %v133_v43, %v584_v2  ;;  %v639_v10 = vmax.f32 %v631_v1, 0.0  ;;  %v369_v18 = vrot.slane %v368_v35, 1  ;;  %v1108_v1 = vld [vmem:[#allocation8 + $0x490] sm:$0xff] }
  0xe9   :  { %v601_v11 = vsub.f32 %v134_v50, %v585_v7  ;;  %792 = vmatmul.f32.vlgmr.msra.gmra.mxu0 %v638_v3  ;;  %v439_v21 = vadd.f32 %v438_v16, %v410_v24  ;;  %v1140_v2 = vld [vmem:[#allocation8 + $0x590] sm:$0xff]  ;;  %v1134_v24 = vld [vmem:[#allocation8 + $0x560] sm:$0xff] }
  0xea   :  { %v624_v12 = vperm.slane %v600_v9, 1  ;;  %812 = vmatmul.f32.vlgmr.msra.gmra.mxu1 %v639_v10  ;;  %v370_v37 = vadd.f32 %v369_v18, %v368_v35  ;;  %v1132_v16 = vld [vmem:[#allocation8 + $0x550] sm:$0xff]  ;;  %v1090_v18 = vld [vmem:[#allocation8 + $0x400] sm:$0xff] }
  0xeb   :  { %v625_v14 = vperm.slane %v601_v11, 1  ;;  %v440_v26 = vrot.slane %v439_v21, 2  ;;  %v1136_v11 = vld [vmem:[#allocation8 + $0x570] sm:$0xff] }
  0xec   :  { %v632_v15 = vadd.f32 %v624_v12, %v616_v23  ;;  %v1995_v42 = vmul.f32 %v1913_v41, %v370_v37  ;;  %v1102_v12 = vld [vmem:[#allocation8 + $0x460] sm:$0xff]  ;;  %v1124_v33 = vld [vmem:[#allocation8 + $0x510] sm:$0xff]  ;;  %v1153_v37 = vld [vmem:[#allocation8 + $0x5f8] sm:$0xff] }
  0xed   :  { %v633_v19 = vadd.f32 %v625_v14, %v617_v13  ;;  %v441_v27 = vadd.f32 %v440_v26, %v439_v21  ;;  %v1130_v21 = vld [vmem:[#allocation8 + $0x540] sm:$0xff] }
  0xee   :  { %v640_v20 = vmax.f32 %v632_v15, 0.0  ;;  %v403_v49 = vsub.f32 %v1989_v28, %v1995_v42  ;;  %v1100_v15 = vld [vmem:[#allocation8 + $0x450] sm:$0xff] }
  0xef   :  { %v641_v22 = vmax.f32 %v633_v19, 0.0  ;;  %v442_v17 = vrot.slane %v441_v27, 1 }
  0xf0   :  { %832 = vmatmul.f32.vlgmr.msra.gmra.mxu2 %v640_v20  ;;  %v411_v52 = vmul.f32 %v403_v49, %v403_v49 }
  0xf1   :  { %852 = vmatmul.f32.vlgmr.msra.gmra.mxu3 %v641_v22  ;;  %872 = vmatmul.f32.vlgmr.msrb.gmra.mxu0 %v638_v3  ;;  %v443_v30 = vadd.f32 %v442_v17, %v441_v27  ;;  %v1138_v3 = vld [vmem:[#allocation8 + $0x580] sm:$0xff]  ;;  %v1096_v27 = vld [vmem:[#allocation8 + $0x430] sm:$0xff] }
  0xf2   :  { %892 = vmatmul.f32.vlgmr.msrb.gmra.mxu1 %v639_v10  ;;  %1218 = vmatpush.msra.mxu2 %v1120_v39  ;;  %v444_v53 = vrot.slane %v411_v52, 4  ;;  %v1128_v17 = vld [vmem:[#allocation8 + $0x530] sm:$0xff]  ;;  %v1119_v39 = vld [vmem:[#allocation8 + $0x4e8] sm:$0xff] }
  0xf3   :  { %v466_v31 = vmul.f32 %v443_v30, %v1913_v41  ;;  %1238 = vmatpush.msra.mxu3 %v1152_v40  ;;  %v1094_v30 = vld [vmem:[#allocation8 + $0x420] sm:$0xff]  ;;  %v1151_v40 = vld [vmem:[#allocation8 + $0x5e8] sm:$0xff] }
  0xf4   :  { %1219 = vmatpush.msra.mxu2 %v1118_v44  ;;  %v445_v46 = vadd.f32 %v444_v53, %v411_v52  ;;  %v1117_v44 = vld [vmem:[#allocation8 + $0x4d8] sm:$0xff]  ;;  %v1111_v53 = vld [vmem:[#allocation8 + $0x4a8] sm:$0xff] }
  0xf5   :  { %v474_v32 = vadd.f32 1e-05, %v466_v31  ;;  %1239 = vmatpush.msra.mxu3 %v1150_v48  ;;  %v1126_v31 = vld [vmem:[#allocation8 + $0x520] sm:$0xff]  ;;  %v1149_v48 = vld [vmem:[#allocation8 + $0x5d8] sm:$0xff] }
  0xf6   :  { %1220 = vmatpush.msra.mxu2 %v1116_v55  ;;  %v446_v0 = vrot.slane %v445_v46, 2  ;;  %v1147_v55 = vld [vmem:[#allocation8 + $0x5c8] sm:$0xff]  ;;  %v1113_v52 = vld [vmem:[#allocation8 + $0x4b8] sm:$0xff] }
  0xf7   :  { %1582 = vrsqrt.f32 %v474_v32  ;;  %vm524_vm14 = vweird.f32 %v474_v32  ;;  %1240 = vmatpush.msra.mxu3 %v1148_v51 }
  0xf8   :  { %912 = vmatmul.f32.vlgmr.msrb.gmra.mxu2 %v640_v20  ;;  %v447_v7 = vadd.f32 %v446_v0, %v445_v46  ;;  %v1098_v20 = vld [vmem:[#allocation8 + $0x440] sm:$0xff]  ;;  %v1141_v46 = vld [vmem:[#allocation8 + $0x598] sm:$0xff] }
  0xf9   :  { %932 = vmatmul.f32.vlgmr.msrb.gmra.mxu3 %v641_v22  ;;  %1221 = vmatpush.msra.mxu2 %v1114_v56  ;;  %v136_v56 = vld [vmem:[#allocation7 + $0x28] sm:$0xff] }
  0xfa   :  { %1241 = vmatpush.msra.mxu3 %v1146_v47  ;;  %v448_v9 = vrot.slane %v447_v7, 1 }
  0xfb   :  { %1222 = vmatpush.msra.mxu2 %v1112_v58 }
  0xfc   :  { %1242 = vmatpush.msra.mxu3 %v1144_v59  ;;  %v449_v23 = vadd.f32 %v448_v9, %v447_v7  ;;  %v1109_v59 = vld [vmem:[#allocation8 + $0x498] sm:$0xff] }
  0xfd   :  { %v1583_v36 = vpop.eup %1582  ;;  %1223 = vmatpush.msra.mxu2 %v1110_v61 }
  0xfe   :  { %v519_v38 = vmul.f32 %v1583_v36, %v474_v32  ;;  %vm525_vm15 = vweird.f32 %v1583_v36  ;;  %1243 = vmatpush.msra.mxu3 %v1142_v62  ;;  %v467_v13 = vmul.f32 %v449_v23, %v1913_v41  ;;  %v1092_v32 = vld [vmem:[#allocation8 + $0x410] sm:$0xff]  ;;  %v1107_v62 = vld [vmem:[#allocation8 + $0x488] sm:$0xff] }
  0xff   :  { %vm526_vm0 = vmor %vm524_vm14, %vm525_vm15  ;;  %1224 = vmatpush.msra.mxu2 %v1108_v1  ;;  %v1105_v1 = vld [vmem:[#allocation8 + $0x478] sm:$0xff]  ;;  %v1131_v23 = vld [vmem:[#allocation8 + $0x548] sm:$0xff] }
 0x100   :  { %v520_v43 = vmul.f32 %v1583_v36, %v519_v38  ;;  %1244 = vmatpush.msra.mxu3 %v1140_v2  ;;  %v475_v19 = vadd.f32 1e-05, %v467_v13  ;;  %v1137_v2 = vld [vmem:[#allocation8 + $0x578] sm:$0xff] }
 0x101   :  { %1225 = vmatpush.msra.mxu2 %v1106_v8  ;;  %v1103_v8 = vld [vmem:[#allocation8 + $0x468] sm:$0xff]  ;;  %v1129_v13 = vld [vmem:[#allocation8 + $0x538] sm:$0xff] }
 0x102   :  { %v521_v50 = vmul.f32 0.5, %v520_v43  ;;  %1245 = vmatpush.msra.mxu3 %v1138_v3  ;;  %1584 = vrsqrt.f32 %v475_v19  ;;  %vm534_vm1 = vweird.f32 %v475_v19  ;;  %v1135_v3 = vld [vmem:[#allocation8 + $0x568] sm:$0xff] }
 0x103   :  { %1226 = vmatpush.msra.mxu2 %v1104_v4 }
 0x104   :  { %v522_v45 = vsub.f32 1.5, %v521_v50  ;;  %1246 = vmatpush.msra.mxu3 %v1136_v11  ;;  %v1115_v50 = vld [vmem:[#allocation8 + $0x4c8] sm:$0xff] }
 0x105   :  { %1227 = vmatpush.msra.mxu2 %v1102_v12  ;;  %v1099_v11 = vld [vmem:[#allocation8 + $0x448] sm:$0xff] }
 0x106   :  { %v523_v57 = vmul.f32 %v1583_v36, %v522_v45  ;;  %1247 = vmatpush.msra.mxu3 %v1134_v24  ;;  %v1145_v45 = vld [vmem:[#allocation8 + $0x5b8] sm:$0xff] }
 0x107   :  { %1228 = vmatpush.msra.mxu2 %v1100_v15  ;;  %v1097_v24 = vld [vmem:[#allocation8 + $0x438] sm:$0xff] }
 0x108   :  { %v527_v60 = vsel %vm526_vm0, %v1583_v36, %v523_v57  ;;  %1248 = vmatpush.msra.mxu3 %v1132_v16  ;;  %v1585_v34 = vpop.eup %1584  ;;  %v1122_v36 = vld [vmem:[#allocation8 + $0x500] sm:$0xff]  ;;  %v1125_v15 = vld [vmem:[#allocation8 + $0x518] sm:$0xff]  ;;  %v1091_v16 = vld [vmem:[#allocation8 + $0x408] sm:$0xff] }
 0x109   :  { %v562_v63 = vmul.f32 %v527_v60, %v135_v54  ;;  %1229 = vmatpush.msra.mxu2 %v1098_v20  ;;  %v529_v35 = vmul.f32 %v1585_v34, %v475_v19  ;;  %vm535_vm2 = vweird.f32 %v1585_v34  ;;  %v1123_v19 = vld [vmem:[#allocation8 + $0x508] sm:$0xff]  ;;  %v2009_v20 = vpop.f32.mrf.mxu2 }
 0x10a   :  { %1249 = vmatpush.msra.mxu3 %v1130_v21  ;;  %vm536_vm3 = vmor %vm534_vm1, %vm535_vm2  ;;  %v371_v21 = vrot.slane %v2009_v20, 4 }
 0x10b   :  { %v570_v5 = vmul.f32 %v562_v63, %v1983_v6  ;;  %v610_v14 = vperm.slane %v562_v63, 0  ;;  %1230 = vmatpush.msra.mxu2 %v1096_v27  ;;  %v530_v38 = vmul.f32 %v1585_v34, %v529_v35  ;;  %v1139_v63 = vld [vmem:[#allocation8 + $0x588] sm:$0xff] }
 0x10c   :  { %1250 = vmatpush.msra.mxu3 %v1128_v17 }
 0x10d   :  { %v586_v10 = vrot.slane %v570_v5, 7  ;;  %v618_v22 = vmul.f32 %v610_v14, %v1967_v25  ;;  %1231 = vmatpush.msra.mxu2 %v1094_v30  ;;  %v1121_v25 = vld [vmem:[#allocation8 + $0x4f8] sm:$0xff]  ;;  %v531_v49 = vmul.f32 0.5, %v530_v38 }
 0x10e   :  { %1251 = vmatpush.msra.mxu3 %v1126_v31  ;;  %v1093_v14 = vld [vmem:[#allocation8 + $0x418] sm:$0xff] }
 0x10f   :  { %v602_v6 = vsub.f32 %v135_v54, %v586_v10  ;;  %1232 = vmatpush.msra.mxu2 %v1092_v32  ;;  %v532_v51 = vsub.f32 1.5, %v531_v49  ;;  %v1143_v54 = vld [vmem:[#allocation8 + $0x5a8] sm:$0xff]  ;;  %v1101_v10 = vld [vmem:[#allocation8 + $0x458] sm:$0xff] }
 0x110   :  { %1252 = vmatpush.msra.mxu3 %v1124_v33  ;;  %v1043_v49 = vld [vmem:[#allocation11 + $0xf8] sm:$0xff] }
 0x111   :  { %v626_v26 = vperm.slane %v602_v6, 1  ;;  %1233 = vmatpush.msra.mxu2 %v1090_v18  ;;  %v533_v47 = vmul.f32 %v1585_v34, %v532_v51  ;;  %v1127_v6 = vld [vmem:[#allocation8 + $0x528] sm:$0xff]  ;;  %1065 = vmatpush.msra.mxu1 %v1043_v49 }
 0x112   :  { %1253 = vmatpush.msra.mxu3 %v1122_v36  ;;  %v1027_v36 = vld [vmem:[#allocation11 + $0x78] sm:$0xff] }
 0x113   :  { %v2002_v29 = vadd.f32 %v626_v26, %v618_v22  ;;  %1298 = vmatpush.msrb.mxu2 %v1121_v25  ;;  %v537_v57 = vsel %vm536_vm3, %v1585_v34, %v533_v47  ;;  %v372_v22 = vadd.f32 %v371_v21, %v2009_v20  ;;  %v2015_v26 = vpop.f32.mrf.mxu3  ;;  %1045 = vmatpush.msra.mxu0 %v1027_v36  ;;  %v1026_v25 = vld [vmem:[#allocation11 + $0x70] sm:$0xff]  ;;  %v1020_v47 = vld [vmem:[#allocation11 + $0x40] sm:$0xff]  ;;  %v1033_v21 = vld [vmem:[#allocation11 + $0xa8] sm:$0xff] }
 0x114   :  { %1318 = vmatpush.msrb.mxu3 %v1153_v37  ;;  %v563_v58 = vmul.f32 %v537_v57, %v136_v56  ;;  %v377_v27 = vrot.slane %v2015_v26, 4  ;;  %v1031_v36 = vld [vmem:[#allocation11 + $0x98] sm:$0xff] }
 0x115   :  { %v642_v43 = vmax.f32 %v2002_v29, 0.0  ;;  %1299 = vmatpush.msrb.mxu2 %v1119_v39  ;;  %v373_v17 = vrot.slane %v372_v22, 2  ;;  %1046 = vmatpush.msra.mxu0 %v1026_v25  ;;  %v1025_v39 = vld [vmem:[#allocation11 + $0x68] sm:$0xff] }
 0x116   :  { %1319 = vmatpush.msrb.mxu3 %v1151_v40  ;;  %v571_v60 = vmul.f32 %v563_v58, %v1995_v42  ;;  %v611_v61 = vperm.slane %v563_v58, 0  ;;  %v1133_v42 = vld [vmem:[#allocation8 + $0x558] sm:$0xff]  ;;  %v378_v30 = vadd.f32 %v377_v27, %v2015_v26  ;;  %v1024_v40 = vld [vmem:[#allocation11 + $0x60] sm:$0xff] }
 0x117   :  { %1234 = vmatmul.f32.vlgmr.msra.gmra.mxu2 %v642_v43  ;;  %v374_v31 = vadd.f32 %v373_v17, %v372_v22  ;;  %1047 = vmatpush.msra.mxu0 %v1025_v39  ;;  %v1019_v58 = vld [vmem:[#allocation11 + $0x38] sm:$0xff]  ;;  %v1012_v17 = vld [vmem:[#allocation11] sm:$0xff] }
 0x118   :  { %1300 = vmatpush.msrb.mxu2 %v1117_v44  ;;  %1320 = vmatpush.msrb.mxu3 %v1149_v48  ;;  %v587_v0 = vrot.slane %v571_v60, 7  ;;  %v619_v7 = vmul.f32 %v611_v61, %v1989_v28  ;;  %v1095_v28 = vld [vmem:[#allocation8 + $0x428] sm:$0xff]  ;;  %v379_v32 = vrot.slane %v378_v30, 2  ;;  %v1023_v48 = vld [vmem:[#allocation11 + $0x58] sm:$0xff]  ;;  %v1018_v61 = vld [vmem:[#allocation11 + $0x30] sm:$0xff] }
 0x119   :  { %v375_v33 = vrot.slane %v374_v31, 1  ;;  %1048 = vmatpush.msra.mxu0 %v1024_v40  ;;  %v1030_v40 = vld [vmem:[#allocation11 + $0x90] sm:$0xff] }
 0x11a   :  { %1301 = vmatpush.msrb.mxu2 %v1115_v50  ;;  %1321 = vmatpush.msrb.mxu3 %v1147_v55  ;;  %v603_v5 = vsub.f32 %v136_v56, %v587_v0  ;;  %v380_v34 = vadd.f32 %v379_v32, %v378_v30  ;;  %v1022_v50 = vld [vmem:[#allocation11 + $0x50] sm:$0xff]  ;;  %v1041_v56 = vld [vmem:[#allocation11 + $0xe8] sm:$0xff]  ;;  %v1032_v30 = vld [vmem:[#allocation11 + $0xa0] sm:$0xff] }
 0x11b   :  { %v376_v35 = vadd.f32 %v375_v33, %v374_v31  ;;  %1049 = vmatpush.msra.mxu0 %v1023_v48  ;;  %v1042_v55 = vld [vmem:[#allocation11 + $0xf0] sm:$0xff] }
 0x11c   :  { %1302 = vmatpush.msrb.mxu2 %v1113_v52  ;;  %1322 = vmatpush.msrb.mxu3 %v1145_v45  ;;  %v627_v9 = vperm.slane %v603_v5, 1  ;;  %v381_v18 = vrot.slane %v380_v34, 1  ;;  %v1021_v45 = vld [vmem:[#allocation11 + $0x48] sm:$0xff]  ;;  %v1184_v33 = vld [vmem:[#allocation8 + $0x6f0] sm:$0xff] }
 0x11d   :  { %v2020_v29 = vmul.f32 %v1913_v41, %v376_v35  ;;  %1050 = vmatpush.msra.mxu0 %v1022_v50  ;;  %1066 = vmatpush.msra.mxu1 %v1042_v55  ;;  %v1180_v48 = vld [vmem:[#allocation8 + $0x6d0] sm:$0xff] }
 0x11e   :  { %1303 = vmatpush.msrb.mxu2 %v1111_v53  ;;  %1323 = vmatpush.msrb.mxu3 %v1143_v54  ;;  %v635_v4 = vadd.f32 %v627_v9, %v619_v7  ;;  %v382_v37 = vadd.f32 %v381_v18, %v380_v34  ;;  %v1040_v53 = vld [vmem:[#allocation11 + $0xe0] sm:$0xff] }
 0x11f   :  { %v404_v38 = vsub.f32 %v2009_v20, %v2020_v29  ;;  %1051 = vmatpush.msra.mxu0 %v1021_v45  ;;  %1067 = vmatpush.msra.mxu1 %v1041_v56  ;;  %v1016_v7 = vld [vmem:[#allocation11 + $0x20] sm:$0xff] }
 0x120   :  { %1304 = vmatpush.msrb.mxu2 %v1109_v59  ;;  %1324 = vmatpush.msrb.mxu3 %v1141_v46  ;;  %v643_v12 = vmax.f32 %v635_v4, 0.0  ;;  %v1039_v59 = vld [vmem:[#allocation11 + $0xd8] sm:$0xff] }
 0x121   :  { %v412_v44 = vmul.f32 %v404_v38, %v404_v38  ;;  %1052 = vmatpush.msra.mxu0 %v1020_v47  ;;  %1068 = vmatpush.msra.mxu1 %v1040_v53  ;;  %v1028_v47 = vld [vmem:[#allocation11 + $0x80] sm:$0xff] }
 0x122   :  { %1305 = vmatpush.msrb.mxu2 %v1107_v62  ;;  %1325 = vmatpush.msrb.mxu3 %v1139_v63  ;;  %v1038_v62 = vld [vmem:[#allocation11 + $0xd0] sm:$0xff] }
 0x123   :  { %1254 = vmatmul.f32.vlgmr.msra.gmra.mxu3 %v643_v12  ;;  %v450_v52 = vrot.slane %v412_v44, 4  ;;  %1053 = vmatpush.msra.mxu0 %v1019_v58 }
 0x124   :  { %1306 = vmatpush.msrb.mxu2 %v1105_v1  ;;  %1326 = vmatpush.msrb.mxu3 %v1137_v2  ;;  %v1017_v1 = vld [vmem:[#allocation11 + $0x28] sm:$0xff] }
 0x125   :  { %v451_v57 = vadd.f32 %v450_v52, %v412_v44  ;;  %1069 = vmatpush.msra.mxu1 %v1039_v59  ;;  %1054 = vmatpush.msra.mxu0 %v1018_v61  ;;  %v1037_v2 = vld [vmem:[#allocation11 + $0xc8] sm:$0xff]  ;;  %v1178_v52 = vld [vmem:[#allocation8 + $0x6c0] sm:$0xff] }
 0x126   :  { %1307 = vmatpush.msrb.mxu2 %v1103_v8  ;;  %1327 = vmatpush.msrb.mxu3 %v1135_v3  ;;  %v1036_v8 = vld [vmem:[#allocation11 + $0xc0] sm:$0xff] }
 0x127   :  { %1070 = vmatpush.msra.mxu1 %v1038_v62  ;;  %v452_v0 = vrot.slane %v451_v57, 2  ;;  %1055 = vmatpush.msra.mxu0 %v1017_v1  ;;  %v1214_v61 = vld [vmem:[#allocation8 + $0x7e0] sm:$0xff]  ;;  %v1172_v1 = vld [vmem:[#allocation8 + $0x690] sm:$0xff] }
 0x128   :  { %1308 = vmatpush.msrb.mxu2 %v1101_v10  ;;  %1328 = vmatpush.msrb.mxu3 %v1133_v42 }
 0x129   :  { %1071 = vmatpush.msra.mxu1 %v1037_v2  ;;  %1056 = vmatpush.msra.mxu0 %v1016_v7  ;;  %v453_v10 = vadd.f32 %v452_v0, %v451_v57  ;;  %v1216_v57 = vld [vmem:[#allocation8 + $0x7f0] sm:$0xff] }
 0x12a   :  { %1309 = vmatpush.msrb.mxu2 %v1099_v11  ;;  %1329 = vmatpush.msrb.mxu3 %v1131_v23  ;;  %v1015_v11 = vld [vmem:[#allocation11 + $0x18] sm:$0xff]  ;;  %v1212_v2 = vld [vmem:[#allocation8 + $0x7d0] sm:$0xff] }
 0x12b   :  { %1072 = vmatpush.msra.mxu1 %v1036_v8  ;;  %v1035_v23 = vld [vmem:[#allocation11 + $0xb8] sm:$0xff]  ;;  %1057 = vmatpush.msra.mxu0 %v1015_v11  ;;  %v1170_v8 = vld [vmem:[#allocation8 + $0x680] sm:$0xff]  ;;  %v1208_v11 = vld [vmem:[#allocation8 + $0x7b0] sm:$0xff] }
 0x12c   :  { %1310 = vmatpush.msrb.mxu2 %v1097_v24  ;;  %1330 = vmatpush.msrb.mxu3 %v1129_v13  ;;  %v1014_v24 = vld [vmem:[#allocation11 + $0x10] sm:$0xff] }
 0x12d   :  { %1073 = vmatpush.msra.mxu1 %v1035_v23  ;;  %v1034_v13 = vld [vmem:[#allocation11 + $0xb0] sm:$0xff]  ;;  %1058 = vmatpush.msra.mxu0 %v1014_v24 }
 0x12e   :  { %1311 = vmatpush.msrb.mxu2 %v1095_v28  ;;  %1331 = vmatpush.msrb.mxu3 %v1127_v6 }
 0x12f   :  { %1074 = vmatpush.msra.mxu1 %v1034_v13  ;;  %v1166_v13 = vld [vmem:[#allocation8 + $0x660] sm:$0xff] }
 0x130   :  { %1312 = vmatpush.msrb.mxu2 %v1093_v14  ;;  %1332 = vmatpush.msrb.mxu3 %v1125_v15  ;;  %v454_v15 = vrot.slane %v453_v10, 1 }
 0x131   :  { %1075 = vmatpush.msra.mxu1 %v1033_v21 }
 0x132   :  { %1313 = vmatpush.msrb.mxu2 %v1091_v16  ;;  %1333 = vmatpush.msrb.mxu3 %v1123_v19  ;;  %v1013_v19 = vld [vmem:[#allocation11 + $0x8] sm:$0xff]  ;;  %v455_v34 = vadd.f32 %v454_v15, %v453_v10 }
 0x133   :  { %1314 = vmatmul.f32.vlgmr.msrb.gmra.mxu2 %v642_v43  ;;  %1334 = vmatmul.f32.vlgmr.msrb.gmra.mxu3 %v643_v12  ;;  %v2025_v43 = vmul.f32 %v1913_v41, %v382_v37  ;;  %v1182_v37 = vld [vmem:[#allocation8 + $0x6e0] sm:$0xff] }
 0x134   :  { %1059 = vmatpush.msra.mxu0 %v1013_v19  ;;  %1076 = vmatpush.msra.mxu1 %v1032_v30  ;;  %v468_v49 = vmul.f32 %v455_v34, %v1913_v41  ;;  %v1204_v19 = vld [vmem:[#allocation8 + $0x790] sm:$0xff]  ;;  %v1202_v30 = vld [vmem:[#allocation8 + $0x780] sm:$0xff] }
 0x135   :  { %v405_v51 = vsub.f32 %v2015_v26, %v2025_v43  ;;  %v1200_v34 = vld [vmem:[#allocation8 + $0x770] sm:$0xff] }
 0x136   :  { %1060 = vmatpush.msra.mxu0 %v1012_v17  ;;  %1077 = vmatpush.msra.mxu1 %v1031_v36  ;;  %v2038_v58 = vadd.f32 1e-05, %v468_v49  ;;  %v1162_v17 = vld [vmem:[#allocation8 + $0x640] sm:$0xff]  ;;  %v1196_v49 = vld [vmem:[#allocation8 + $0x750] sm:$0xff] }
 0x137   :  { %v413_v54 = vmul.f32 %v405_v51, %v405_v51  ;;  %v1029_v51 = vld [vmem:[#allocation11 + $0x88] sm:$0xff] }
 0x138   :  { %1258 = vmatpush.msrb.mxu0 %v1184_v33  ;;  %1078 = vmatpush.msra.mxu1 %v1030_v40  ;;  %1586 = vrsqrt.f32 %v2038_v58  ;;  %v1160_v33 = vld [vmem:[#allocation8 + $0x630] sm:$0xff]  ;;  %vm544_vm4 = vweird.f32 %v2038_v58 }
 0x139   :  { %v456_v63 = vrot.slane %v413_v54, 4 }
 0x13a   :  { %1259 = vmatpush.msrb.mxu0 %v1182_v37  ;;  %1079 = vmatpush.msra.mxu1 %v1029_v51  ;;  %v1158_v37 = vld [vmem:[#allocation8 + $0x620] sm:$0xff] }
 0x13b   :  { %v457_v3 = vadd.f32 %v456_v63, %v413_v54  ;;  %v1176_v54 = vld [vmem:[#allocation8 + $0x6b0] sm:$0xff] }
 0x13c   :  { %1260 = vmatpush.msrb.mxu0 %v1180_v48  ;;  %1080 = vmatpush.msra.mxu1 %v1028_v47  ;;  %v1156_v48 = vld [vmem:[#allocation8 + $0x610] sm:$0xff] }
 0x13d   :  { %v458_v28 = vrot.slane %v457_v3, 2 }
 0x13e   :  { %1261 = vmatpush.msrb.mxu0 %v1178_v52  ;;  %1278 = vmatpush.msrb.mxu1 %v1216_v57  ;;  %v1154_v52 = vld [vmem:[#allocation8 + $0x600] sm:$0xff] }
 0x13f   :  { %v459_v31 = vadd.f32 %v458_v28, %v457_v3  ;;  %v1210_v3 = vld [vmem:[#allocation8 + $0x7c0] sm:$0xff] }
 0x140   :  { %1262 = vmatpush.msrb.mxu0 %v1176_v54  ;;  %1279 = vmatpush.msrb.mxu1 %v1214_v61  ;;  %v1206_v28 = vld [vmem:[#allocation8 + $0x7a0] sm:$0xff] }
 0x141   :  { %v460_v44 = vrot.slane %v459_v31, 1 }
 0x142   :  { %1280 = vmatpush.msrb.mxu1 %v1212_v2 }
 0x143   :  { %v461_v53 = vadd.f32 %v460_v44, %v459_v31 }
 0x144   :  { %1281 = vmatpush.msrb.mxu1 %v1210_v3 }
 0x145   :  { %v469_v0 = vmul.f32 %v461_v53, %v1913_v41  ;;  %v1192_v53 = vld [vmem:[#allocation8 + $0x730] sm:$0xff] }
 0x146   :  { %1282 = vmatpush.msrb.mxu1 %v1208_v11 }
 0x148   :  { %1283 = vmatpush.msrb.mxu1 %v1206_v28  ;;  %v646_v28 = vld [vmem:[#allocation10] sm:$0xff] }
 0x14a   :  { %1284 = vmatpush.msrb.mxu1 %v1204_v19 }
 0x14c   :  { %1285 = vmatpush.msrb.mxu1 %v1202_v30 }
 0x14e   :  { %1286 = vmatpush.msrb.mxu1 %v1200_v34 }
 0x166   :  { %v793_v46 = vpop.f32.mrf.mxu0 }
 0x167   :  { %v813_v60 = vpop.f32.mrf.mxu1 }
 0x168   :  { %v814_v5 = vadd.f32 %v813_v60, %v793_v46  ;;  %v1174_v60 = vld [vmem:[#allocation8 + $0x6a0] sm:$0xff] }
 0x169   :  { %1263 = vmatpush.msrb.mxu0 %v1174_v60  ;;  %v1190_v60 = vld [vmem:[#allocation8 + $0x720] sm:$0xff] }
 0x16b   :  { %1264 = vmatpush.msrb.mxu0 %v1172_v1 }
 0x16d   :  { %1265 = vmatpush.msrb.mxu0 %v1170_v8 }
 0x16e   :  { %v873_v6 = vpop.f32.mrf.mxu0 }
 0x16f   :  { %v893_v14 = vpop.f32.mrf.mxu1 }
 0x170   :  { %v894_v22 = vadd.f32 %v893_v14, %v873_v6  ;;  %v2052_v6 = vpop.eup %1586 }
 0x171   :  { %vm545_vm5 = vweird.f32 %v2052_v6 }
 0x172   :  { %vm546_vm6 = vmor %vm544_vm4, %vm545_vm5 }
 0x173   :  { %v833_v9 = vpop.f32.mrf.mxu2 }
 0x174   :  { %v834_v42 = vadd.f32 %v833_v9, %v814_v5  ;;  %v853_v4 = vpop.f32.mrf.mxu3 }
 0x176   :  { %v2029_v12 = vadd.f32 %v853_v4, %v834_v42  ;;  %v2047_v42 = vadd.f32 1e-05, %v469_v0  ;;  %v1168_v4 = vld [vmem:[#allocation8 + $0x670] sm:$0xff] }
 0x177   :  { %1266 = vmatpush.msrb.mxu0 %v1168_v4 }
 0x178   :  { %v936_v16 = vrot.slane %v2029_v12, 4  ;;  %1588 = vrsqrt.f32 %v2047_v42  ;;  %vm554_vm7 = vweird.f32 %v2047_v42 }
 0x179   :  { %1267 = vmatpush.msrb.mxu0 %v1166_v13 }
 0x17a   :  { %v937_v27 = vadd.f32 %v936_v16, %v2029_v12  ;;  %v1164_v16 = vld [vmem:[#allocation8 + $0x650] sm:$0xff] }
 0x17b   :  { %v913_v32 = vpop.f32.mrf.mxu2  ;;  %1268 = vmatpush.msrb.mxu0 %v1164_v16 }
 0x17c   :  { %v938_v35 = vrot.slane %v937_v27, 2  ;;  %v914_v18 = vadd.f32 %v913_v32, %v894_v22  ;;  %v933_v25 = vpop.f32.mrf.mxu3 }
 0x17d   :  { %1269 = vmatpush.msrb.mxu0 %v1162_v17 }
 0x17e   :  { %v939_v38 = vadd.f32 %v938_v35, %v937_v27  ;;  %v2033_v39 = vadd.f32 %v933_v25, %v914_v18  ;;  %v539_v27 = vmul.f32 %v2052_v6, %v2038_v58  ;;  %v2059_v36 = vpop.eup %1588 }
 0x17f   :  { %1270 = vmatpush.msrb.mxu0 %v1160_v33  ;;  %vm555_vm8 = vweird.f32 %v2059_v36 }
 0x180   :  { %v940_v50 = vrot.slane %v939_v38, 1  ;;  %v942_v55 = vrot.slane %v2033_v39, 4  ;;  %v540_v25 = vmul.f32 %v2052_v6, %v539_v27  ;;  %vm556_vm10 = vmor %vm554_vm7, %vm555_vm8 }
 0x181   :  { %1271 = vmatpush.msrb.mxu0 %v1158_v37 }
 0x182   :  { %v941_v45 = vadd.f32 %v940_v50, %v939_v38  ;;  %v943_v56 = vadd.f32 %v942_v55, %v2033_v39  ;;  %v1198_v38 = vld [vmem:[#allocation8 + $0x760] sm:$0xff]  ;;  %v549_v50 = vmul.f32 %v2059_v36, %v2047_v42 }
 0x183   :  { %1287 = vmatpush.msrb.mxu1 %v1198_v38  ;;  %1272 = vmatpush.msrb.mxu0 %v1156_v48 }
 0x184   :  { %v2041_v59 = vmul.f32 %v941_v45, %v1913_v41  ;;  %v944_v46 = vrot.slane %v943_v56, 2  ;;  %v1194_v45 = vld [vmem:[#allocation8 + $0x740] sm:$0xff]  ;;  %v550_v54 = vmul.f32 %v2059_v36, %v549_v50 }
 0x185   :  { %1288 = vmatpush.msrb.mxu1 %v1196_v49  ;;  %1273 = vmatpush.msrb.mxu0 %v1154_v52 }
 0x186   :  { %v950_v62 = vsub.f32 %v2029_v12, %v2041_v59  ;;  %v945_v63 = vadd.f32 %v944_v46, %v943_v56  ;;  %v541_v56 = vmul.f32 0.5, %v540_v25  ;;  %v551_v0 = vmul.f32 0.5, %v550_v54 }
 0x187   :  { %1289 = vmatpush.msrb.mxu1 %v1194_v45 }
 0x188   :  { %v952_v5 = vmul.f32 %v950_v62, %v950_v62  ;;  %v946_v7 = vrot.slane %v945_v63, 1  ;;  %v542_v46 = vsub.f32 1.5, %v541_v56  ;;  %v1188_v62 = vld [vmem:[#allocation8 + $0x710] sm:$0xff]  ;;  %v552_v3 = vsub.f32 1.5, %v551_v0  ;;  %v1185_v56 = vld [vmem:[#allocation8 + $0x6f8] sm:$0xff] }
 0x189   :  { %1290 = vmatpush.msrb.mxu1 %v1192_v53  ;;  %v1183_v53 = vld [vmem:[#allocation8 + $0x6e8] sm:$0xff] }
 0x18a   :  { %v954_v9 = vrot.slane %v952_v5, 4  ;;  %v947_v10 = vadd.f32 %v946_v7, %v945_v63  ;;  %v543_v2 = vmul.f32 %v2052_v6, %v542_v46  ;;  %v1186_v7 = vld [vmem:[#allocation8 + $0x700] sm:$0xff]  ;;  %v553_v13 = vmul.f32 %v2059_v36, %v552_v3  ;;  %v1173_v3 = vld [vmem:[#allocation8 + $0x698] sm:$0xff] }
 0x18b   :  { %1291 = vmatpush.msrb.mxu1 %v1190_v60 }
 0x18c   :  { %v955_v23 = vadd.f32 %v954_v9, %v952_v5  ;;  %v2050_v24 = vmul.f32 %v947_v10, %v1913_v41  ;;  %v137_v9 = vld [vmem:[#allocation7 + $0x30] sm:$0xff]  ;;  %v547_v10 = vsel %vm546_vm6, %v2052_v6, %v543_v2  ;;  %v557_v42 = vsel %vm556_vm10, %v2059_v36, %v553_v13  ;;  %v1177_v2 = vld [vmem:[#allocation8 + $0x6b8] sm:$0xff]  ;;  %v1207_v13 = vld [vmem:[#allocation8 + $0x7a8] sm:$0xff] }
 0x18d   :  { %1292 = vmatpush.msrb.mxu1 %v1188_v62 }
 0x18e   :  { %v956_v14 = vrot.slane %v955_v23, 2  ;;  %v951_v15 = vsub.f32 %v2033_v39, %v2050_v24 }
 0x18f   :  { %1293 = vmatpush.msrb.mxu1 %v1186_v7  ;;  %v1175_v7 = vld [vmem:[#allocation8 + $0x6a8] sm:$0xff] }
 0x190   :  { %v957_v21 = vadd.f32 %v956_v14, %v955_v23  ;;  %v953_v22 = vmul.f32 %v951_v15, %v951_v15  ;;  %v564_v23 = vmul.f32 %v547_v10, %v137_v9  ;;  %v1171_v10 = vld [vmem:[#allocation8 + $0x688] sm:$0xff] }
 0x192   :  { %v958_v31 = vrot.slane %v957_v21, 1  ;;  %v960_v32 = vrot.slane %v953_v22, 4  ;;  %v572_v6 = vmul.f32 %v564_v23, %v2020_v29  ;;  %v612_v37 = vperm.slane %v564_v23, 0  ;;  %v1167_v23 = vld [vmem:[#allocation8 + $0x668] sm:$0xff] }
 0x194   :  { %v959_v35 = vadd.f32 %v958_v31, %v957_v21  ;;  %v961_v18 = vadd.f32 %v960_v32, %v953_v22  ;;  %v138_v21 = vld [vmem:[#allocation7 + $0x38] sm:$0xff]  ;;  %v588_v32 = vrot.slane %v572_v6, 7  ;;  %v620_v50 = vmul.f32 %v612_v37, %v2009_v20  ;;  %v1179_v20 = vld [vmem:[#allocation8 + $0x6c8] sm:$0xff] }
 0x195   :  { %v565_v30 = vmul.f32 %v557_v42, %v138_v21  ;;  %v1201_v6 = vld [vmem:[#allocation8 + $0x778] sm:$0xff]  ;;  %v1199_v42 = vld [vmem:[#allocation8 + $0x768] sm:$0xff] }
 0x196   :  { %v966_v40 = vmul.f32 %v959_v35, %v1913_v41  ;;  %v962_v44 = vrot.slane %v961_v18, 2  ;;  %v647_v35 = vld [vmem:[#allocation10 + $0x8] sm:$0xff]  ;;  %v604_v36 = vsub.f32 %v137_v9, %v588_v32  ;;  %v1213_v9 = vld [vmem:[#allocation8 + $0x7d8] sm:$0xff] }
 0x197   :  { %v573_v29 = vmul.f32 %v565_v30, %v2025_v43  ;;  %v613_v54 = vperm.slane %v565_v30, 0  ;;  %v1195_v30 = vld [vmem:[#allocation8 + $0x748] sm:$0xff] }
 0x198   :  { %v968_v55 = vadd.f32 1e-05, %v966_v40  ;;  %v963_v51 = vadd.f32 %v962_v44, %v961_v18  ;;  %v1191_v32 = vld [vmem:[#allocation8 + $0x728] sm:$0xff] }
 0x199   :  { %v621_v62 = vmul.f32 %v613_v54, %v2015_v26  ;;  %v1211_v26 = vld [vmem:[#allocation8 + $0x7c8] sm:$0xff] }
 0x19a   :  { %1590 = vrsqrt.f32 %v968_v55  ;;  %v964_v47 = vrot.slane %v963_v51, 1  ;;  %vm976_vm11 = vweird.f32 %v968_v55 }
 0x19c   :  { %v965_v57 = vadd.f32 %v964_v47, %v963_v51  ;;  %v628_v51 = vperm.slane %v604_v36, 1 }
 0x19e   :  { %v967_v61 = vmul.f32 %v965_v57, %v1913_v41  ;;  %v2081_v57 = vadd.f32 %v628_v51, %v620_v50  ;;  %v1470_v51 = vld [vmem:[#allocation11 + $0x178] sm:$0xff] }
 0x19f   :  { %1488 = vmatpush.msra.mxu2 %v1470_v51 }
 0x1a0   :  { %v1591_v63 = vpop.eup %1590  ;;  %v969_v1 = vadd.f32 1e-05, %v967_v61 }
 0x1a1   :  { %v971_v5 = vmul.f32 %v1591_v63, %v968_v55  ;;  %vm977_vm9 = vweird.f32 %v1591_v63  ;;  %v589_v55 = vrot.slane %v573_v29, 7 }
 0x1a2   :  { %1592 = vrsqrt.f32 %v969_v1  ;;  %vm978_vm12 = vmor %vm976_vm11, %vm977_vm9  ;;  %vm986_vm14 = vweird.f32 %v969_v1 }
 0x1a3   :  { %v972_v8 = vmul.f32 %v1591_v63, %v971_v5  ;;  %v1217_v5 = vld [vmem:[#allocation8 + $0x7f8] sm:$0xff] }
 0x1a5   :  { %v973_v58 = vmul.f32 0.5, %v972_v8  ;;  %v1215_v8 = vld [vmem:[#allocation8 + $0x7e8] sm:$0xff] }
 0x1a6   :  { %v1255_v36 = vpop.f32.mrf.mxu3 }
 0x1a7   :  { %v974_v4 = vsub.f32 1.5, %v973_v58 }
 0x1a8   :  { %v1593_v11 = vpop.eup %1592 }
 0x1a9   :  { %v975_v14 = vmul.f32 %v1591_v63, %v974_v4  ;;  %v981_v15 = vmul.f32 %v1593_v11, %v969_v1  ;;  %vm987_vm13 = vweird.f32 %v1593_v11  ;;  %v644_v1 = vmax.f32 %v2081_v57, 0.0  ;;  %v1169_v4 = vld [vmem:[#allocation8 + $0x678] sm:$0xff] }
 0x1aa   :  { %vm988_vm15 = vmor %vm986_vm14, %vm987_vm13  ;;  %v1466_v57 = vld [vmem:[#allocation11 + $0x158] sm:$0xff] }
 0x1ab   :  { %v979_v16 = vsel %vm978_vm12, %v1591_v63, %v975_v14  ;;  %v982_v19 = vmul.f32 %v1593_v11, %v981_v15  ;;  %v1205_v14 = vld [vmem:[#allocation8 + $0x798] sm:$0xff]  ;;  %v1163_v15 = vld [vmem:[#allocation8 + $0x648] sm:$0xff] }
 0x1ac   :  { %v990_v22 = vmul.f32 %v979_v16, %v646_v28  ;;  %v1203_v16 = vld [vmem:[#allocation8 + $0x788] sm:$0xff] }
 0x1ad   :  { %v983_v27 = vmul.f32 0.5, %v982_v19  ;;  %v1161_v19 = vld [vmem:[#allocation8 + $0x638] sm:$0xff] }
 0x1ae   :  { %v992_v17 = vmul.f32 %v990_v22, %v2041_v59  ;;  %v1002_v33 = vperm.slane %v990_v22, 0  ;;  %v1157_v22 = vld [vmem:[#allocation8 + $0x618] sm:$0xff] }
 0x1af   :  { %v984_v31 = vsub.f32 1.5, %v983_v27  ;;  %v1197_v27 = vld [vmem:[#allocation8 + $0x758] sm:$0xff] }
 0x1b0   :  { %v996_v34 = vrot.slane %v992_v17, 7  ;;  %v1004_v40 = vmul.f32 %v1002_v33, %v2029_v12  ;;  %v605_v12 = vsub.f32 %v138_v21, %v589_v55  ;;  %v1159_v21 = vld [vmem:[#allocation8 + $0x628] sm:$0xff]  ;;  %v1189_v33 = vld [vmem:[#allocation8 + $0x718] sm:$0xff] }
 0x1b1   :  { %v985_v18 = vmul.f32 %v1593_v11, %v984_v31  ;;  %v1155_v17 = vld [vmem:[#allocation8 + $0x608] sm:$0xff]  ;;  %v1193_v31 = vld [vmem:[#allocation8 + $0x738] sm:$0xff] }
 0x1b2   :  { %v1000_v25 = vsub.f32 %v646_v28, %v996_v34  ;;  %v629_v63 = vperm.slane %v605_v12, 1  ;;  %v1165_v28 = vld [vmem:[#allocation8 + $0x658] sm:$0xff]  ;;  %v1187_v34 = vld [vmem:[#allocation8 + $0x708] sm:$0xff] }
 0x1b3   :  { %v989_v38 = vsel %vm988_vm15, %v1593_v11, %v985_v18  ;;  %v1209_v11 = vld [vmem:[#allocation8 + $0x7b8] sm:$0xff]  ;;  %v1044_v18 = vld [vmem:[#allocation13] ss:$0 sm:$0xff] }
 0x1b4   :  { %v991_v44 = vmul.f32 %v989_v38, %v647_v35  ;;  %v1006_v59 = vperm.slane %v1000_v25, 1  ;;  %v1235_v38 = vpop.f32.mrf.mxu2 }
 0x1b6   :  { %v993_v48 = vmul.f32 %v991_v44, %v2050_v24  ;;  %v1008_v49 = vadd.f32 %v1006_v59, %v1004_v40  ;;  %v1003_v52 = vperm.slane %v991_v44, 0  ;;  %v1181_v24 = vld [vmem:[#allocation8 + $0x6d8] sm:$0xff]  ;;  %v1256_v44 = vadd.f32 %v1255_v36, %v1235_v38  ;;  %v1479_v36 = vld [vmem:[#allocation11 + $0x1c0] sm:$0xff] }
 0x1b8   :  { %v1010_v45 = vmax.f32 %v1008_v49, 0.0  ;;  %v997_v47 = vrot.slane %v993_v48, 7  ;;  %v1005_v46 = vmul.f32 %v1003_v52, %v2033_v39  ;;  %v637_v39 = vadd.f32 %v629_v63, %v621_v62 }
 0x1ba   :  { %1061 = vmatmul.f32.vlgmr.msra.gmra.mxu0 %v1010_v45  ;;  %v1001_v43 = vsub.f32 %v647_v35, %v997_v47  ;;  %v645_v58 = vmax.f32 %v637_v39, 0.0  ;;  %v1469_v45 = vld [vmem:[#allocation11 + $0x170] sm:$0xff]  ;;  %v1468_v47 = vld [vmem:[#allocation11 + $0x168] sm:$0xff] }
 0x1bb   :  { %1338 = vmatpush.msra.mxu0 %v1185_v56  ;;  %1489 = vmatpush.msra.mxu2 %v1469_v45  ;;  %v1476_v45 = vld [vmem:[#allocation11 + $0x1a8] sm:$0xff] }
 0x1bc   :  { %v1007_v60 = vperm.slane %v1001_v43, 1  ;;  %v1467_v43 = vld [vmem:[#allocation11 + $0x160] sm:$0xff] }
 0x1bd   :  { %1339 = vmatpush.msra.mxu0 %v1183_v53  ;;  %1490 = vmatpush.msra.mxu2 %v1468_v47 }
 0x1be   :  { %v1009_v61 = vadd.f32 %v1007_v60, %v1005_v46  ;;  %v1465_v46 = vld [vmem:[#allocation11 + $0x150] sm:$0xff]  ;;  %v1315_v60 = vpop.f32.mrf.mxu2 }
 0x1bf   :  { %1340 = vmatpush.msra.mxu0 %v1181_v24  ;;  %1491 = vmatpush.msra.mxu2 %v1467_v43  ;;  %v1474_v43 = vld [vmem:[#allocation11 + $0x198] sm:$0xff] }
 0x1c0   :  { %v1011_v0 = vmax.f32 %v1009_v61, 0.0  ;;  %v1464_v61 = vld [vmem:[#allocation11 + $0x148] sm:$0xff] }
 0x1c1   :  { %1341 = vmatpush.msra.mxu0 %v1179_v20  ;;  %1492 = vmatpush.msra.mxu2 %v1466_v57  ;;  %v1335_v20 = vpop.f32.mrf.mxu3 }
 0x1c2   :  { %1081 = vmatmul.f32.vlgmr.msra.gmra.mxu1 %v1011_v0  ;;  %1274 = vmatmul.f32.vlgmr.msrb.gmra.mxu0 %v644_v1  ;;  %v1463_v0 = vld [vmem:[#allocation11 + $0x140] sm:$0xff] }
 0x1c3   :  { %1342 = vmatpush.msra.mxu0 %v1177_v2  ;;  %1358 = vmatpush.msra.mxu1 %v1217_v5  ;;  %v1462_v5 = vld [vmem:[#allocation11 + $0x138] sm:$0xff] }
 0x1c4   :  { %1493 = vmatpush.msra.mxu2 %v1465_v46 }
 0x1c5   :  { %1343 = vmatpush.msra.mxu0 %v1175_v7  ;;  %1359 = vmatpush.msra.mxu1 %v1215_v8 }
 0x1c6   :  { %1494 = vmatpush.msra.mxu2 %v1464_v61 }
 0x1c7   :  { %1344 = vmatpush.msra.mxu0 %v1173_v3  ;;  %1360 = vmatpush.msra.mxu1 %v1213_v9  ;;  %v1461_v3 = vld [vmem:[#allocation11 + $0x130] sm:$0xff] }
 0x1c8   :  { %1495 = vmatpush.msra.mxu2 %v1463_v0 }
 0x1c9   :  { %1345 = vmatpush.msra.mxu0 %v1171_v10  ;;  %1361 = vmatpush.msra.mxu1 %v1211_v26  ;;  %v1460_v26 = vld [vmem:[#allocation11 + $0x128] sm:$0xff] }
 0x1ca   :  { %1294 = vmatmul.f32.vlgmr.msrb.gmra.mxu1 %v645_v58  ;;  %1496 = vmatpush.msra.mxu2 %v1462_v5 }
 0x1cb   :  { %1346 = vmatpush.msra.mxu0 %v1169_v4  ;;  %1362 = vmatpush.msra.mxu1 %v1209_v11  ;;  %v1459_v11 = vld [vmem:[#allocation11 + $0x120] sm:$0xff] }
 0x1cc   :  { %1497 = vmatpush.msra.mxu2 %v1461_v3 }
 0x1cd   :  { %1347 = vmatpush.msra.mxu0 %v1167_v23  ;;  %1363 = vmatpush.msra.mxu1 %v1207_v13 }
 0x1ce   :  { %1498 = vmatpush.msra.mxu2 %v1460_v26 }
 0x1cf   :  { %1348 = vmatpush.msra.mxu0 %v1165_v28  ;;  %1364 = vmatpush.msra.mxu1 %v1205_v14  ;;  %v1486_v28 = vld [vmem:[#allocation11 + $0x1f8] sm:$0xff] }
 0x1d0   :  { %1499 = vmatpush.msra.mxu2 %v1459_v11  ;;  %1508 = vmatpush.msra.mxu3 %v1486_v28  ;;  %v1458_v14 = vld [vmem:[#allocation11 + $0x118] sm:$0xff] }
 0x1d1   :  { %1349 = vmatpush.msra.mxu0 %v1163_v15  ;;  %1365 = vmatpush.msra.mxu1 %v1203_v16 }
 0x1d2   :  { %1500 = vmatpush.msra.mxu2 %v1458_v14 }
 0x1d3   :  { %1350 = vmatpush.msra.mxu0 %v1161_v19  ;;  %1366 = vmatpush.msra.mxu1 %v1201_v6  ;;  %v1485_v19 = vld [vmem:[#allocation11 + $0x1f0] sm:$0xff] }
 0x1d4   :  { %1509 = vmatpush.msra.mxu3 %v1485_v19  ;;  %v1457_v6 = vld [vmem:[#allocation11 + $0x110] sm:$0xff] }
 0x1d5   :  { %1351 = vmatpush.msra.mxu0 %v1159_v21  ;;  %1367 = vmatpush.msra.mxu1 %v1199_v42 }
 0x1d6   :  { %1501 = vmatpush.msra.mxu2 %v1457_v6 }
 0x1d7   :  { %1352 = vmatpush.msra.mxu0 %v1157_v22  ;;  %1368 = vmatpush.msra.mxu1 %v1197_v27  ;;  %v1484_v22 = vld [vmem:[#allocation11 + $0x1e8] sm:$0xff] }
 0x1d8   :  { %1510 = vmatpush.msra.mxu3 %v1484_v22  ;;  %v1456_v27 = vld [vmem:[#allocation11 + $0x108] sm:$0xff] }
 0x1d9   :  { %1353 = vmatpush.msra.mxu0 %v1155_v17  ;;  %1369 = vmatpush.msra.mxu1 %v1195_v30 }
 0x1da   :  { %1354 = vmatmul.f32.vlgmr.msra.gmra.mxu0 %v644_v1  ;;  %v1336_v1 = vadd.f32 %v1335_v20, %v1315_v60  ;;  %1502 = vmatpush.msra.mxu2 %v1456_v27  ;;  %v1487_v27 = vld [vmem:[#allocation13 + $0x8] ss:$0 sm:$0xff] }
 0x1db   :  { %1370 = vmatpush.msra.mxu1 %v1193_v31  ;;  %v1483_v31 = vld [vmem:[#allocation11 + $0x1e0] sm:$0xff] }
 0x1dc   :  { %1511 = vmatpush.msra.mxu3 %v1483_v31 }
 0x1dd   :  { %1371 = vmatpush.msra.mxu1 %v1191_v32  ;;  %v1455_v32 = vld [vmem:[#allocation11 + $0x100] sm:$0xff] }
 0x1de   :  { %1503 = vmatpush.msra.mxu2 %v1455_v32 }
 0x1df   :  { %1372 = vmatpush.msra.mxu1 %v1189_v33 }
 0x1e1   :  { %1373 = vmatpush.msra.mxu1 %v1187_v34  ;;  %v1482_v34 = vld [vmem:[#allocation11 + $0x1d8] sm:$0xff] }
 0x1e2   :  { %1374 = vmatmul.f32.vlgmr.msra.gmra.mxu1 %v645_v58  ;;  %1512 = vmatpush.msra.mxu3 %v1482_v34 }
 0x237   :  { %v1062_v35 = vpop.f32.mrf.mxu0 }
 0x238   :  { %v1063_v25 = vadd.f32 %v1062_v35, %v1044_v18  ;;  %v1481_v18 = vld [vmem:[#allocation11 + $0x1d0] sm:$0xff] }
 0x239   :  { %1513 = vmatpush.msra.mxu3 %v1481_v18 }
 0x23f   :  { %v1082_v37 = vpop.f32.mrf.mxu1  ;;  %v1275_v40 = vpop.f32.mrf.mxu0 }
 0x240   :  { %v1083_v29 = vadd.f32 %v1082_v37, %v1063_v25  ;;  %v1276_v59 = vadd.f32 %v1275_v40, %v1256_v44  ;;  %v1480_v37 = vld [vmem:[#allocation11 + $0x1c8] sm:$0xff] }
 0x241   :  { %1514 = vmatpush.msra.mxu3 %v1480_v37 }
 0x242   :  { %1085 = vst [vmem:[#allocation14] sm:$0xff] %v1083_v29 }
 0x243   :  { %1515 = vmatpush.msra.mxu3 %v1479_v36 }
 0x247   :  { %v1295_v48 = vpop.f32.mrf.mxu1 }
 0x248   :  { %v2086_v49 = vadd.f32 %v1295_v48, %v1276_v59  ;;  %v1478_v59 = vld [vmem:[#allocation11 + $0x1b8] sm:$0xff] }
 0x249   :  { %1516 = vmatpush.msra.mxu3 %v1478_v59 }
 0x24a   :  { %v1378_v50 = vrot.slane %v2086_v49, 4 }
 0x24c   :  { %v1379_v55 = vadd.f32 %v1378_v50, %v2086_v49 }
 0x24e   :  { %v1380_v52 = vrot.slane %v1379_v55, 2 }
 0x250   :  { %v1381_v56 = vadd.f32 %v1380_v52, %v1379_v55  ;;  %v1477_v55 = vld [vmem:[#allocation11 + $0x1b0] sm:$0xff] }
 0x251   :  { %1517 = vmatpush.msra.mxu3 %v1477_v55 }
 0x252   :  { %v1382_v53 = vrot.slane %v1381_v56, 1 }
 0x253   :  { %1518 = vmatpush.msra.mxu3 %v1476_v45 }
 0x254   :  { %v1383_v54 = vadd.f32 %v1382_v53, %v1381_v56  ;;  %v1475_v53 = vld [vmem:[#allocation11 + $0x1a0] sm:$0xff] }
 0x255   :  { %1519 = vmatpush.msra.mxu3 %v1475_v53 }
 0x256   :  { %v2091_v12 = vmul.f32 %v1383_v54, %v1913_v41  ;;  %v1087_v54 = vld [vmem:[#allocation10 + $0x10] sm:$0xff] }
 0x257   :  { %v1355_v63 = vpop.f32.mrf.mxu0  ;;  %1520 = vmatpush.msra.mxu3 %v1474_v43 }
 0x258   :  { %v1392_v24 = vsub.f32 %v2086_v49, %v2091_v12  ;;  %v1356_v8 = vadd.f32 %v1355_v63, %v1336_v1  ;;  %v1471_v1 = vld [vmem:[#allocation11 + $0x180] sm:$0xff] }
 0x25a   :  { %v1394_v62 = vmul.f32 %v1392_v24, %v1392_v24  ;;  %v1473_v24 = vld [vmem:[#allocation11 + $0x190] sm:$0xff] }
 0x25b   :  { %1521 = vmatpush.msra.mxu3 %v1473_v24 }
 0x25c   :  { %v1396_v2 = vrot.slane %v1394_v62, 4 }
 0x25e   :  { %v1397_v7 = vadd.f32 %v1396_v2, %v1394_v62  ;;  %v1472_v62 = vld [vmem:[#allocation11 + $0x188] sm:$0xff] }
 0x25f   :  { %v1375_v39 = vpop.f32.mrf.mxu1  ;;  %1522 = vmatpush.msra.mxu3 %v1472_v62 }
 0x260   :  { %v1398_v9 = vrot.slane %v1397_v7, 2  ;;  %v2095_v10 = vadd.f32 %v1375_v39, %v1356_v8 }
 0x261   :  { %1523 = vmatpush.msra.mxu3 %v1471_v1 }
 0x262   :  { %v1399_v58 = vadd.f32 %v1398_v9, %v1397_v7  ;;  %v1384_v4 = vrot.slane %v2095_v10, 4 }
 0x264   :  { %v1400_v23 = vrot.slane %v1399_v58, 1  ;;  %v1385_v13 = vadd.f32 %v1384_v4, %v2095_v10 }
 0x266   :  { %v1401_v15 = vadd.f32 %v1400_v23, %v1399_v58  ;;  %v1386_v16 = vrot.slane %v1385_v13, 2 }
 0x268   :  { %v1408_v21 = vmul.f32 %v1401_v15, %v1913_v41  ;;  %v1387_v42 = vadd.f32 %v1386_v16, %v1385_v13 }
 0x26a   :  { %v1410_v17 = vadd.f32 1e-05, %v1408_v21  ;;  %v1388_v30 = vrot.slane %v1387_v42, 1 }
 0x26c   :  { %1594 = vrsqrt.f32 %v1410_v17  ;;  %v1389_v33 = vadd.f32 %v1388_v30, %v1387_v42  ;;  %vm1418_vm1 = vweird.f32 %v1410_v17 }
 0x26e   :  { %v2101_v35 = vmul.f32 %v1389_v33, %v1913_v41 }
 0x270   :  { %v1393_v25 = vsub.f32 %v2095_v10, %v2101_v35 }
 0x272   :  { %v1595_v29 = vpop.eup %1594  ;;  %v1395_v38 = vmul.f32 %v1393_v25, %v1393_v25 }
 0x273   :  { %v1413_v40 = vmul.f32 %v1595_v29, %v1410_v17  ;;  %vm1419_vm0 = vweird.f32 %v1595_v29 }
 0x274   :  { %v1402_v44 = vrot.slane %v1395_v38, 4  ;;  %vm1420_vm2 = vmor %vm1418_vm1, %vm1419_vm0 }
 0x275   :  { %v1414_v48 = vmul.f32 %v1595_v29, %v1413_v40 }
 0x276   :  { %v1403_v50 = vadd.f32 %v1402_v44, %v1395_v38 }
 0x277   :  { %v1415_v51 = vmul.f32 0.5, %v1414_v48 }
 0x278   :  { %v1404_v52 = vrot.slane %v1403_v50, 2 }
 0x279   :  { %v1416_v56 = vsub.f32 1.5, %v1415_v51 }
 0x27a   :  { %v1405_v47 = vadd.f32 %v1404_v52, %v1403_v50 }
 0x27b   :  { %v1417_v57 = vmul.f32 %v1595_v29, %v1416_v56 }
 0x27c   :  { %v1406_v46 = vrot.slane %v1405_v47, 1 }
 0x27d   :  { %v1421_v60 = vsel %vm1420_vm2, %v1595_v29, %v1417_v57 }
 0x27e   :  { %v1432_v20 = vmul.f32 %v1421_v60, %v1087_v54  ;;  %v1407_v61 = vadd.f32 %v1406_v46, %v1405_v47 }
 0x280   :  { %v1434_v63 = vmul.f32 %v1432_v20, %v2091_v12  ;;  %v1409_v0 = vmul.f32 %v1407_v61, %v1913_v41  ;;  %v1444_v2 = vperm.slane %v1432_v20, 0  ;;  %v1088_v41 = vld [vmem:[#allocation10 + $0x18] sm:$0xff] }
 0x282   :  { %v1411_v5 = vadd.f32 1e-05, %v1409_v0  ;;  %v1438_v7 = vrot.slane %v1434_v63, 7  ;;  %v1446_v39 = vmul.f32 %v1444_v2, %v2086_v49 }
 0x284   :  { %1596 = vrsqrt.f32 %v1411_v5  ;;  %v1442_v8 = vsub.f32 %v1087_v54, %v1438_v7  ;;  %vm1428_vm4 = vweird.f32 %v1411_v5 }
 0x286   :  { %v1448_v3 = vperm.slane %v1442_v8, 1 }
 0x288   :  { %v1450_v9 = vadd.f32 %v1448_v3, %v1446_v39 }
 0x28a   :  { %v1597_v26 = vpop.eup %1596  ;;  %v1452_v58 = vmax.f32 %v1450_v9, 0.0 }
 0x28b   :  { %v1423_v4 = vmul.f32 %v1597_v26, %v1411_v5  ;;  %vm1429_vm3 = vweird.f32 %v1597_v26 }
 0x28c   :  { %1504 = vmatmul.f32.vlgmr.msra.gmra.mxu2 %v1452_v58  ;;  %vm1430_vm5 = vmor %vm1428_vm4, %vm1429_vm3 }
 0x28d   :  { %v1424_v11 = vmul.f32 %v1597_v26, %v1423_v4 }
 0x28f   :  { %v1425_v12 = vmul.f32 0.5, %v1424_v11 }
 0x291   :  { %v1426_v23 = vsub.f32 1.5, %v1425_v12 }
 0x293   :  { %v1427_v13 = vmul.f32 %v1597_v26, %v1426_v23 }
 0x295   :  { %v1431_v28 = vsel %vm1430_vm5, %v1597_v26, %v1427_v13 }
 0x296   :  { %v1433_v14 = vmul.f32 %v1431_v28, %v1088_v41 }
 0x298   :  { %v1435_v15 = vmul.f32 %v1433_v14, %v2101_v35  ;;  %v1445_v16 = vperm.slane %v1433_v14, 0 }
 0x29a   :  { %v1439_v49 = vrot.slane %v1435_v15, 7  ;;  %v1447_v6 = vmul.f32 %v1445_v16, %v2095_v10 }
 0x29c   :  { %v1443_v19 = vsub.f32 %v1088_v41, %v1439_v49 }
 0x29e   :  { %v1449_v21 = vperm.slane %v1443_v19, 1 }
 0x2a0   :  { %v1451_v42 = vadd.f32 %v1449_v21, %v1447_v6 }
 0x2a2   :  { %v1453_v22 = vmax.f32 %v1451_v42, 0.0 }
 0x2a4   :  { %1524 = vmatmul.f32.vlgmr.msra.gmra.mxu3 %v1453_v22 }
 0x30f   :  { %v1505_v17 = vpop.f32.mrf.mxu2 }
 0x310   :  { %v1506_v30 = vadd.f32 %v1505_v17, %v1487_v27 }
 0x327   :  { %v1525_v31 = vpop.f32.mrf.mxu3 }
 0x328   :  { %v1526_v32 = vadd.f32 %v1525_v31, %v1506_v30 }
 0x32a   :  { %1528 = vst [vmem:[#allocation14 + $0x8] sm:$0xff] %v1526_v32 }
 0x32b   :  { %1539 = dma.vmem_to_hbm [thread:$0]  %s1535_s6, 256, %s1537_s15, [#allocation4]  }
 0x32c   :  { %1798 = dma.done.wait [#allocation4], 256  }
 0x32d   :  { %1799 = vsyncadd [#allocation4], 4294967040 }
 0x32e   :  { %1544 = vsyncpa [#allocation3], 1 }
 0x32f   :  { %1545 = vsyncpa [#allocation6], 1 }
 0x330   :  { %1546 = vsyncpa [#allocation9], 1 }
 0x331   :  { %1547 = vsyncpa [#allocation12], 1 }
 0x332   :  { %1548 = vsyncpa [#allocation4], 1 }

</bundles_post_ra>
